<compile_context>
chip_gen: v7x
topology: tpu7x:2x2x1
jax: 0.10.0
libtpu: 0.0.40
codegen_flags: <defaults>
</compile_context>

<pallas_src>
import functools

import jax
import jax.numpy as jnp
from jax.experimental import pallas as pl
from jax.experimental.pallas import tpu as pltpu

LATENT_DIM = 128
CONDITION_DIM = 14
COND_K = 16                      # condition projection zero-padded to the bf16 sublane tile
HIDDEN_DIM = 1                   # module-level global in the reference script
INPUT_DIM = 24                   # CVAE passes input_dim as the decoder's output_dim
OUTPUT_DIM = INPUT_DIM
OUT_PAD = 128                    # lane-dense output width (fc_output padded 24 -> 128)
BN_EPS = 1e-5
_HID1 = 512
_HID2 = 128 * HIDDEN_DIM         # fc2 / BN width

assert HIDDEN_DIM == 1, "kernel assumes hidden_dim == 1 (as in the reference script)"


def _detect_elementwise_dtype():
    # bf16 VPU/EUP path exists on v6e/v7x; v5e and older keep elementwise math in f32.
    try:
        kind = jax.devices()[0].device_kind.lower()
    except Exception:
        return jnp.float32
    if any(t in kind for t in ("v2", "v3", "v4", "v5")):
        return jnp.float32
    return jnp.bfloat16


_ELEM_DTYPE = _detect_elementwise_dtype()

# Largest batch handled as one fused block (whole batch resident in VMEM for the BN stats).
# 2048 rows is ~12 MiB of live VMEM for this model -> fits every generation incl. v7x.
_SINGLE_BLOCK_MAX = 2048
_FUSED_VMEM_LIMIT = 32 * 1024 * 1024

_GELU_C0 = 0.7978845608028654    # sqrt(2/pi)
_GELU_C1 = 0.044715


# ---------------------------------------------------------------------------
# Math helpers
# ---------------------------------------------------------------------------
def _gelu(x):
    # tanh-approximate GELU: one EUP tanh + a handful of VALU ops.
    # TODO(synk): PyTorch F.gelu default is exact-erf; tanh approx differs by <~3e-3 pre-sigmoid.
    x = x.astype(_ELEM_DTYPE)
    inner = _GELU_C0 * x * (1.0 + _GELU_C1 * x * x)
    return 0.5 * x * (1.0 + jnp.tanh(inner))


def _dot_bf16(x, w_ref):
    # bf16 operands feed the MXU at native rate on v5e/v6e/v7x; accumulate in f32.
    return jnp.dot(x.astype(jnp.bfloat16), w_ref[...],
                   preferred_element_type=jnp.float32)


# ---------------------------------------------------------------------------
# Kernels
# ---------------------------------------------------------------------------
def _decoder_fused_kernel(z_ref, c_ref, w1z_ref, w1c_ref, b1_ref, w2_ref, b2_ref,
                          gamma_ref, beta_ref, wout_ref, bout_ref, out_ref):
    """Whole batch in one block: fc1 -> gelu -> fc2 -> gelu -> BN -> fc_out -> sigmoid."""
    h = _gelu(_dot_bf16(z_ref[...], w1z_ref) + _dot_bf16(c_ref[...], w1c_ref) + b1_ref[...])
    h = _gelu(_dot_bf16(h, w2_ref) + b2_ref[...])                      # (B, 128)

    # BatchNorm1d, training-mode batch stats (biased variance), fused affine (f32 stats).
    h32 = h.astype(jnp.float32)
    mean = jnp.mean(h32, axis=0, keepdims=True)
    var = jnp.mean(h32 * h32, axis=0, keepdims=True) - mean * mean
    scale = gamma_ref[...] * jax.lax.rsqrt(var + BN_EPS)
    shift = beta_ref[...] - mean * scale
    hbn = h32 * scale + shift

    # view(B, 1, 128) is a no-op for hidden_dim == 1; lane-dense padded fc_output + sigmoid.
    logits = _dot_bf16(hbn, wout_ref) + bout_ref[...]
    out_ref[...] = jax.nn.sigmoid(logits)                              # (B, 128)


def _hidden_stats_kernel(z_ref, c_ref, w1z_ref, w1c_ref, b1_ref, w2_ref, b2_ref,
                         h2_ref, psum_ref, psumsq_ref):
    """Pass 1 (parallel batch grid): per-tile hidden activations + per-tile BN partial sums."""
    h = _gelu(_dot_bf16(z_ref[...], w1z_ref) + _dot_bf16(c_ref[...], w1c_ref) + b1_ref[...])
    h2 = _gelu(_dot_bf16(h, w2_ref) + b2_ref[...])
    h2_ref[...] = h2.astype(h2_ref.dtype)          # bf16 HBM roundtrip (halves h2 traffic)

    h2f = h2.astype(jnp.float32)                   # accumulate BN statistics in f32
    psum_ref[...] = jnp.sum(h2f, axis=0, keepdims=True).reshape(1, 1, _HID2)
    psumsq_ref[...] = jnp.sum(h2f * h2f, axis=0, keepdims=True).reshape(1, 1, _HID2)


def _bn_output_kernel(h2_ref, scale_ref, shift_ref, wout_ref, bout_ref, out_ref):
    """Pass 2 (parallel batch grid): apply fused BN affine + fc_output + sigmoid."""
    h = h2_ref[...].astype(jnp.float32) * scale_ref[...] + shift_ref[...]
    logits = _dot_bf16(h, wout_ref) + bout_ref[...]
    out_ref[...] = jax.nn.sigmoid(logits)


# ---------------------------------------------------------------------------
# Parameters
# ---------------------------------------------------------------------------
def init_params(key):
    """PyTorch-style Linear init (U(-1/sqrt(fan_in), +1/sqrt(fan_in))), f32 masters."""
    ks = jax.random.split(key, 6)

    def lin(kw, kb, fan_in, fan_out):
        bound = 1.0 / (fan_in ** 0.5)
        w = jax.random.uniform(kw, (fan_in, fan_out), jnp.float32, -bound, bound)
        b = jax.random.uniform(kb, (1, fan_out), jnp.float32, -bound, bound)
        return w, b

    w1, b1 = lin(ks[0], ks[1], LATENT_DIM + CONDITION_DIM, _HID1)
    w2, b2 = lin(ks[2], ks[3], _HID1, _HID2)
    wout, bout = lin(ks[4], ks[5], 128, OUTPUT_DIM)
    gamma = jnp.ones((1, _HID2), jnp.float32)      # BatchNorm1d default affine init
    beta = jnp.zeros((1, _HID2), jnp.float32)
    return dict(w1=w1, b1=b1, w2=w2, b2=b2, gamma=gamma, beta=beta, wout=wout, bout=bout)


def prepare_params(p):
    """Kernel-layout params, converted ONCE (not per call):
    W1 split at the z/c boundary, condition block zero-padded to K=16, fc_output zero-padded
    to 128 lanes; weight matrices cast to bf16; biases / BN affine stay f32."""
    w1z = p["w1"][:LATENT_DIM].astype(jnp.bfloat16)                           # (128, 512)
    w1c = jnp.zeros((COND_K, _HID1), jnp.bfloat16).at[:CONDITION_DIM, :].set(
        p["w1"][LATENT_DIM:].astype(jnp.bfloat16))                            # (16, 512)
    wout = jnp.zeros((128, OUT_PAD), jnp.bfloat16).at[:, :OUTPUT_DIM].set(
        p["wout"].astype(jnp.bfloat16))                                       # (128, 128)
    bout = jnp.zeros((1, OUT_PAD), jnp.float32).at[:, :OUTPUT_DIM].set(p["bout"])
    return (
        w1z, w1c,
        p["b1"],                                   # (1, 512) f32
        p["w2"].astype(jnp.bfloat16),              # (512, 128)
        p["b2"],                                   # (1, 128) f32
        p["gamma"],                                # (1, 128) f32
        p["beta"],                                 # (1, 128) f32
        wout, bout,
    )


# ---------------------------------------------------------------------------
# Forward wrapper
# ---------------------------------------------------------------------------
def _auto_batch_tile(n):
    for t in (2048, 1024, 512, 256, 128, 64, 32, 16):
        if n > t and n % t == 0:
            return t
    # TODO(synk): awkward very large batches fall back to one fused block; pad the batch
    # upstream if that ever exceeds the per-generation VMEM budget.
    return n


@functools.partial(jax.jit, static_argnames=("batch_tile",))
def decoder_forward(z, c, kparams, *, batch_tile=None):
    w1z, w1c, b1, w2, b2, gamma, beta, wout, bout = kparams
    B = z.shape[0]
    assert z.shape[1] == LATENT_DIM and c.shape[1] == CONDITION_DIM
    c = jnp.pad(c, ((0, 0), (0, COND_K - CONDITION_DIM)))   # K=16-aligned condition input

    bt = batch_tile if batch_tile is not None else (
        B if B <= _SINGLE_BLOCK_MAX else _auto_batch_tile(B))
    assert B % bt == 0, (B, bt)

    if bt == B:
        # Single-block fused path: no h2 HBM roundtrip, one kernel launch.
        vmem = pl.BlockSpec(memory_space=pltpu.MemorySpace.VMEM)
        out = pl.pallas_call(
            _decoder_fused_kernel,
            out_shape=jax.ShapeDtypeStruct((B, OUT_PAD), jnp.float32),
            in_specs=[vmem] * 11,
            out_specs=vmem,
            compiler_params=pltpu.CompilerParams(vmem_limit_bytes=_FUSED_VMEM_LIMIT),
        )(z, c, w1z, w1c, b1, w2, b2, gamma, beta, wout, bout)
        return out[:, :OUTPUT_DIM].reshape(B, HIDDEN_DIM, OUTPUT_DIM)

    # Batch-gridded two-pass path (BN couples all batch tiles -> two-phase reduction).
    assert bt % 16 == 0, "batch tile must be a multiple of 16 (bf16 sublane tile)"
    nt = B // bt
    grid = (nt,)
    tile_map = lambda i: (i, 0)
    const_map = lambda i: (0, 0)   # weights stay VMEM-resident across grid steps

    h2, psum, psumsq = pl.pallas_call(
        _hidden_stats_kernel,
        grid=grid,
        in_specs=[
            pl.BlockSpec((bt, LATENT_DIM), tile_map),
            pl.BlockSpec((bt, COND_K), tile_map),
            pl.BlockSpec((LATENT_DIM, _HID1), const_map),
            pl.BlockSpec((COND_K, _HID1), const_map),
            pl.BlockSpec((1, _HID1), const_map),
            pl.BlockSpec((_HID1, _HID2), const_map),
            pl.BlockSpec((1, _HID2), const_map),
        ],
        out_specs=[
            pl.BlockSpec((bt, _HID2), tile_map),
            pl.BlockSpec((1, 1, _HID2), lambda i: (i, 0, 0)),
            pl.BlockSpec((1, 1, _HID2), lambda i: (i, 0, 0)),
        ],
        out_shape=[
            jax.ShapeDtypeStruct((B, _HID2), jnp.bfloat16),        # h2 roundtrip in bf16
            jax.ShapeDtypeStruct((nt, 1, _HID2), jnp.float32),     # per-tile BN sum
            jax.ShapeDtypeStruct((nt, 1, _HID2), jnp.float32),     # per-tile BN sum-of-squares
        ],
        compiler_params=pltpu.CompilerParams(dimension_semantics=("parallel",)),
    )(z, c, w1z, w1c, b1, w2, b2)

    # Tiny cross-tile BN reduction + fused affine coefficients (a few (1,128) ops in JAX).
    mean = jnp.sum(psum, axis=0) / B
    var = jnp.sum(psumsq, axis=0) / B - mean * mean        # biased variance (training-mode BN)
    scale = gamma * jax.lax.rsqrt(var + BN_EPS)
    shift = beta - mean * scale

    out = pl.pallas_call(
        _bn_output_kernel,
        grid=grid,
        in_specs=[
            pl.BlockSpec((bt, _HID2), tile_map),
            pl.BlockSpec((1, _HID2), const_map),
            pl.BlockSpec((1, _HID2), const_map),
            pl.BlockSpec((128, OUT_PAD), const_map),
            pl.BlockSpec((1, OUT_PAD), const_map),
        ],
        out_specs=pl.BlockSpec((bt, OUT_PAD), tile_map),
        out_shape=jax.ShapeDtypeStruct((B, OUT_PAD), jnp.float32),
        compiler_params=pltpu.CompilerParams(dimension_semantics=("parallel",)),
    )(h2, scale, shift, wout, bout)

    return out[:, :OUTPUT_DIM].reshape(B, HIDDEN_DIM, OUTPUT_DIM)


# ---------------------------------------------------------------------------
# Pure-JAX reference (f32 math, exact-erf GELU = PyTorch F.gelu default)
# ---------------------------------------------------------------------------
def decoder_reference(z, c, kparams):
    w1z, w1c, b1, w2, b2, gamma, beta, wout, bout = kparams
    w1z, w1c, w2, wout = (w.astype(jnp.float32) for w in (w1z, w1c, w2, wout))
    c = jnp.pad(c, ((0, 0), (0, COND_K - CONDITION_DIM)))
    h = jax.nn.gelu(z @ w1z + c @ w1c + b1, approximate=False)
    h = jax.nn.gelu(h @ w2 + b2, approximate=False)
    mean = jnp.mean(h, axis=0, keepdims=True)
    var = jnp.mean((h - mean) ** 2, axis=0, keepdims=True)   # biased variance (training-mode)
    h = (h - mean) * jax.lax.rsqrt(var + BN_EPS) * gamma + beta
    h = h.reshape(h.shape[0], HIDDEN_DIM, 128)
    out = jax.nn.sigmoid(h @ wout + bout)
    return out[..., :OUTPUT_DIM]


if __name__ == "__main__":
    key = jax.random.PRNGKey(0)
    kz, kc, kp, kz2, kc2 = jax.random.split(key, 5)

    params = init_params(kp)
    kparams = prepare_params(params)

    # Tolerance note: kernel uses bf16 matmul operands, bf16 h2 roundtrip, tanh-approx GELU
    # (bf16 elementwise on v6e/v7x) vs an exact-erf f32 reference -> a few 1e-3 on the sigmoid
    # output; 3e-2 leaves safety margin.
    TOL = 3e-2

    # Small batch -> fused single-block path.
    B1 = 64
    z1 = jax.random.normal(kz, (B1, LATENT_DIM), jnp.float32)
    c1 = jax.random.normal(kc, (B1, CONDITION_DIM), jnp.float32)
    out1 = decoder_forward(z1, c1, kparams)
    jax.block_until_ready(out1)
    assert out1.shape == (B1, HIDDEN_DIM, OUTPUT_DIM), out1.shape
    ref1 = decoder_reference(z1, c1, kparams)
    err1 = float(jnp.max(jnp.abs(out1 - ref1)))
    assert err1 < TOL, err1

    # Larger batch with forced tiling -> gridded two-pass (parallel pass 1 + JAX BN reduce).
    B2 = 256
    z2 = jax.random.normal(kz2, (B2, LATENT_DIM), jnp.float32)
    c2 = jax.random.normal(kc2, (B2, CONDITION_DIM), jnp.float32)
    out2 = decoder_forward(z2, c2, kparams, batch_tile=64)
    jax.block_until_ready(out2)
    assert out2.shape == (B2, HIDDEN_DIM, OUTPUT_DIM), out2.shape
    ref2 = decoder_reference(z2, c2, kparams)
    err2 = float(jnp.max(jnp.abs(out2 - ref2)))
    assert err2 < TOL, err2

    print("KERNEL_OK")
</pallas_src>

<mosaic_0001>
module attributes {stable_mosaic.version = 11 : i64} {
  func.func @_decoder_fused_kernel(%arg0: memref<64x128xf32, #tpu.memory_space<vmem>>, %arg1: memref<64x16xf32, #tpu.memory_space<vmem>>, %arg2: memref<128x512xbf16, #tpu.memory_space<vmem>>, %arg3: memref<16x512xbf16, #tpu.memory_space<vmem>>, %arg4: memref<1x512xf32, #tpu.memory_space<vmem>>, %arg5: memref<512x128xbf16, #tpu.memory_space<vmem>>, %arg6: memref<1x128xf32, #tpu.memory_space<vmem>>, %arg7: memref<1x128xf32, #tpu.memory_space<vmem>>, %arg8: memref<1x128xf32, #tpu.memory_space<vmem>>, %arg9: memref<128x128xbf16, #tpu.memory_space<vmem>>, %arg10: memref<1x128xf32, #tpu.memory_space<vmem>>, %arg11: memref<64x128xf32, #tpu.memory_space<vmem>>) attributes {dimension_semantics = [], scalar_prefetch = 0 : i64, scratch_operands = 0 : i64, tpu.core_type = #tpu.core_type<tc>} {
    %c0 = arith.constant 0 : index
    %c0_0 = arith.constant 0 : index
    %0 = vector.load %arg0[%c0, %c0_0] : memref<64x128xf32, #tpu.memory_space<vmem>>, vector<64x128xf32>
    %1 = arith.truncf %0 : vector<64x128xf32> to vector<64x128xbf16>
    %c0_1 = arith.constant 0 : index
    %c0_2 = arith.constant 0 : index
    %2 = vector.load %arg2[%c0_1, %c0_2] : memref<128x512xbf16, #tpu.memory_space<vmem>>, vector<128x512xbf16>
    %cst = arith.constant dense<0.000000e+00> : vector<64x512xf32>
    %3 = tpu.matmul %1, %2, %cst {dimension_numbers = #tpu.dot_dimension_numbers<[1], [0], [0], [1], [0, 0, 1, 1], [], []>} : vector<64x128xbf16>, vector<128x512xbf16>, vector<64x512xf32> -> vector<64x512xf32>
    %c0_3 = arith.constant 0 : index
    %c0_4 = arith.constant 0 : index
    %4 = vector.load %arg1[%c0_3, %c0_4] : memref<64x16xf32, #tpu.memory_space<vmem>>, vector<64x16xf32>
    %5 = arith.truncf %4 : vector<64x16xf32> to vector<64x16xbf16>
    %c0_5 = arith.constant 0 : index
    %c0_6 = arith.constant 0 : index
    %6 = vector.load %arg3[%c0_5, %c0_6] : memref<16x512xbf16, #tpu.memory_space<vmem>>, vector<16x512xbf16>
    %cst_7 = arith.constant dense<0.000000e+00> : vector<64x512xf32>
    %7 = tpu.matmul %5, %6, %cst_7 {dimension_numbers = #tpu.dot_dimension_numbers<[1], [0], [0], [1], [0, 0, 1, 1], [], []>} : vector<64x16xbf16>, vector<16x512xbf16>, vector<64x512xf32> -> vector<64x512xf32>
    %8 = arith.addf %3, %7 : vector<64x512xf32>
    %c0_8 = arith.constant 0 : index
    %c0_9 = arith.constant 0 : index
    %9 = vector.load %arg4[%c0_8, %c0_9] : memref<1x512xf32, #tpu.memory_space<vmem>>, vector<1x512xf32>
    %10 = vector.broadcast %9 : vector<1x512xf32> to vector<64x512xf32>
    %11 = arith.addf %8, %10 : vector<64x512xf32>
    %12 = arith.truncf %11 : vector<64x512xf32> to vector<64x512xbf16>
    %cst_10 = arith.constant 7.968750e-01 : bf16
    %13 = vector.broadcast %cst_10 : bf16 to vector<64x512xbf16>
    %14 = arith.mulf %13, %12 : vector<64x512xbf16>
    %cst_11 = arith.constant 4.467770e-02 : bf16
    %15 = vector.broadcast %cst_11 : bf16 to vector<64x512xbf16>
    %16 = arith.mulf %15, %12 : vector<64x512xbf16>
    %17 = arith.mulf %16, %12 : vector<64x512xbf16>
    %cst_12 = arith.constant 1.000000e+00 : bf16
    %18 = vector.broadcast %cst_12 : bf16 to vector<64x512xbf16>
    %19 = arith.addf %18, %17 : vector<64x512xbf16>
    %20 = arith.mulf %14, %19 : vector<64x512xbf16>
    %cst_13 = arith.constant 5.000000e-01 : bf16
    %21 = vector.broadcast %cst_13 : bf16 to vector<64x512xbf16>
    %22 = arith.mulf %21, %12 : vector<64x512xbf16>
    %23 = math.tanh %20 : vector<64x512xbf16>
    %cst_14 = arith.constant 1.000000e+00 : bf16
    %24 = vector.broadcast %cst_14 : bf16 to vector<64x512xbf16>
    %25 = arith.addf %24, %23 : vector<64x512xbf16>
    %26 = arith.mulf %22, %25 : vector<64x512xbf16>
    %c0_15 = arith.constant 0 : index
    %c0_16 = arith.constant 0 : index
    %27 = vector.load %arg5[%c0_15, %c0_16] : memref<512x128xbf16, #tpu.memory_space<vmem>>, vector<512x128xbf16>
    %cst_17 = arith.constant dense<0.000000e+00> : vector<64x128xf32>
    %28 = tpu.matmul %26, %27, %cst_17 {dimension_numbers = #tpu.dot_dimension_numbers<[1], [0], [0], [1], [0, 0, 1, 1], [], []>} : vector<64x512xbf16>, vector<512x128xbf16>, vector<64x128xf32> -> vector<64x128xf32>
    %c0_18 = arith.constant 0 : index
    %c0_19 = arith.constant 0 : index
    %29 = vector.load %arg6[%c0_18, %c0_19] : memref<1x128xf32, #tpu.memory_space<vmem>>, vector<1x128xf32>
    %30 = vector.broadcast %29 : vector<1x128xf32> to vector<64x128xf32>
    %31 = arith.addf %28, %30 : vector<64x128xf32>
    %32 = arith.truncf %31 : vector<64x128xf32> to vector<64x128xbf16>
    %cst_20 = arith.constant 7.968750e-01 : bf16
    %33 = vector.broadcast %cst_20 : bf16 to vector<64x128xbf16>
    %34 = arith.mulf %33, %32 : vector<64x128xbf16>
    %cst_21 = arith.constant 4.467770e-02 : bf16
    %35 = vector.broadcast %cst_21 : bf16 to vector<64x128xbf16>
    %36 = arith.mulf %35, %32 : vector<64x128xbf16>
    %37 = arith.mulf %36, %32 : vector<64x128xbf16>
    %cst_22 = arith.constant 1.000000e+00 : bf16
    %38 = vector.broadcast %cst_22 : bf16 to vector<64x128xbf16>
    %39 = arith.addf %38, %37 : vector<64x128xbf16>
    %40 = arith.mulf %34, %39 : vector<64x128xbf16>
    %cst_23 = arith.constant 5.000000e-01 : bf16
    %41 = vector.broadcast %cst_23 : bf16 to vector<64x128xbf16>
    %42 = arith.mulf %41, %32 : vector<64x128xbf16>
    %43 = math.tanh %40 : vector<64x128xbf16>
    %cst_24 = arith.constant 1.000000e+00 : bf16
    %44 = vector.broadcast %cst_24 : bf16 to vector<64x128xbf16>
    %45 = arith.addf %44, %43 : vector<64x128xbf16>
    %46 = arith.mulf %42, %45 : vector<64x128xbf16>
    %47 = arith.extf %46 : vector<64x128xbf16> to vector<64x128xf32>
    %cst_25 = arith.constant dense<0.000000e+00> : vector<128xf32>
    %48 = vector.multi_reduction <add>, %47, %cst_25 [0] : vector<64x128xf32> to vector<128xf32>
    %49 = vector.shape_cast %48 : vector<128xf32> to vector<1x128xf32>
    %cst_26 = arith.constant 6.400000e+01 : f32
    %50 = vector.broadcast %cst_26 : f32 to vector<1x128xf32>
    %51 = arith.divf %49, %50 : vector<1x128xf32>
    %52 = arith.mulf %47, %47 : vector<64x128xf32>
    %cst_27 = arith.constant dense<0.000000e+00> : vector<128xf32>
    %53 = vector.multi_reduction <add>, %52, %cst_27 [0] : vector<64x128xf32> to vector<128xf32>
    %54 = vector.shape_cast %53 : vector<128xf32> to vector<1x128xf32>
    %cst_28 = arith.constant 6.400000e+01 : f32
    %55 = vector.broadcast %cst_28 : f32 to vector<1x128xf32>
    %56 = arith.divf %54, %55 : vector<1x128xf32>
    %57 = arith.mulf %51, %51 : vector<1x128xf32>
    %58 = arith.subf %56, %57 : vector<1x128xf32>
    %c0_29 = arith.constant 0 : index
    %c0_30 = arith.constant 0 : index
    %59 = vector.load %arg7[%c0_29, %c0_30] : memref<1x128xf32, #tpu.memory_space<vmem>>, vector<1x128xf32>
    %cst_31 = arith.constant 9.99999974E-6 : f32
    %60 = vector.broadcast %cst_31 : f32 to vector<1x128xf32>
    %61 = arith.addf %58, %60 : vector<1x128xf32>
    %62 = math.rsqrt %61 : vector<1x128xf32>
    %63 = arith.mulf %59, %62 : vector<1x128xf32>
    %c0_32 = arith.constant 0 : index
    %c0_33 = arith.constant 0 : index
    %64 = vector.load %arg8[%c0_32, %c0_33] : memref<1x128xf32, #tpu.memory_space<vmem>>, vector<1x128xf32>
    %65 = arith.mulf %51, %63 : vector<1x128xf32>
    %66 = arith.subf %64, %65 : vector<1x128xf32>
    %67 = vector.broadcast %63 : vector<1x128xf32> to vector<64x128xf32>
    %68 = arith.mulf %47, %67 : vector<64x128xf32>
    %69 = vector.broadcast %66 : vector<1x128xf32> to vector<64x128xf32>
    %70 = arith.addf %68, %69 : vector<64x128xf32>
    %71 = arith.truncf %70 : vector<64x128xf32> to vector<64x128xbf16>
    %c0_34 = arith.constant 0 : index
    %c0_35 = arith.constant 0 : index
    %72 = vector.load %arg9[%c0_34, %c0_35] : memref<128x128xbf16, #tpu.memory_space<vmem>>, vector<128x128xbf16>
    %cst_36 = arith.constant dense<0.000000e+00> : vector<64x128xf32>
    %73 = tpu.matmul %71, %72, %cst_36 {dimension_numbers = #tpu.dot_dimension_numbers<[1], [0], [0], [1], [0, 0, 1, 1], [], []>} : vector<64x128xbf16>, vector<128x128xbf16>, vector<64x128xf32> -> vector<64x128xf32>
    %c0_37 = arith.constant 0 : index
    %c0_38 = arith.constant 0 : index
    %74 = vector.load %arg10[%c0_37, %c0_38] : memref<1x128xf32, #tpu.memory_space<vmem>>, vector<1x128xf32>
    %75 = vector.broadcast %74 : vector<1x128xf32> to vector<64x128xf32>
    %76 = arith.addf %73, %75 : vector<64x128xf32>
    %77 = arith.negf %76 : vector<64x128xf32>
    %78 = math.exp %77 : vector<64x128xf32>
    %cst_39 = arith.constant 1.000000e+00 : f32
    %79 = vector.broadcast %cst_39 : f32 to vector<64x128xf32>
    %80 = arith.addf %79, %78 : vector<64x128xf32>
    %81 = arith.divf %79, %80 : vector<64x128xf32>
    %c0_40 = arith.constant 0 : index
    %c0_41 = arith.constant 0 : index
    %82 = vector.load %arg11[%c0_40, %c0_41] : memref<64x128xf32, #tpu.memory_space<vmem>>, vector<64x128xf32>
    tpu.vector_store %arg11[%c0_40, %c0_41], %81 {strides = array<i32>} : memref<64x128xf32, #tpu.memory_space<vmem>>, vector<64x128xf32>,
    return
  }
}

</mosaic_0001>

<bundles_post_ra>
// kernel: decoder_forward.1
= control target key start
LH: loop header
LB: loop body
LE: loop exit
PB: predicated region body
PF: predicated region fallthrough
CT: control target
= control target key end

     0   :  { %16 = vsyncpa [#allocation3], 0  ;;  %s2470_s0 = inlined_call_operand.vmem [shape: f32[64,128], index: 0, kind: input, shape index: {}]   ;;  %s2471_s1 = inlined_call_operand.vmem [shape: f32[64,16], index: 1, kind: input, shape index: {}]   ;;  %s2472_s2 = inlined_call_operand.hbm [shape: bf16[128,512], index: 2, kind: input, shape index: {}]   ;;  %s2473_s3 = inlined_call_operand.vmem [shape: bf16[16,512], index: 3, kind: input, shape index: {}]   ;;  %s2474_s4 = inlined_call_operand.vmem [shape: f32[1,512], index: 4, kind: input, shape index: {}]   ;;  %s2475_s5 = inlined_call_operand.hbm [shape: bf16[512,128], index: 5, kind: input, shape index: {}]   ;;  %s2476_s6 = inlined_call_operand.vmem [shape: f32[1,128], index: 6, kind: input, shape index: {}]   ;;  %s2477_s7 = inlined_call_operand.vmem [shape: f32[1,128], index: 7, kind: input, shape index: {}]   ;;  %s2478_s8 = inlined_call_operand.vmem [shape: f32[1,128], index: 8, kind: input, shape index: {}]   ;;  %s2479_s9 = inlined_call_operand.vmem [shape: bf16[128,128], index: 9, kind: input, shape index: {}]   ;;  %s2480_s10 = inlined_call_operand.vmem [shape: f32[1,128], index: 10, kind: input, shape index: {}]   ;;  %s2481_s11 = inlined_call_operand.vmem [shape: f32[64,128], index: 11, kind: output, shape index: {}]  }
   0x1   :  { %17 = vsyncpa [#allocation5], 0  ;;  %s2028_s17 = smov [#allocation2]   ;;  %s1980_s21 = scalar_lea.hbm %s2472_s2, 4096 }
   0x2   :  { %s27_s18 = sshll.u32 %s2028_s17, 4  ;;  %p1981_p0 = scmp.ne.s32.totalorder %s2472_s2, %s1980_s21  ;;  %s28_s18 = int_to_ptr.vmem [resolvable:$true] %s27_s18 }
   0x3   :  { %p1984_p1 = scmp.lt.u32.totalorder %s1980_s21, %s2472_s2 }
   0x5   :  { %p1986_p2 = pnand %p1984_p1, %p1981_p0 }
   0x7   :  { %1989 = shalt.err (!%p1986_p2)
}
   0x8   :  { %s1990_s26 = scalar_lea.vmem %s28_s18, 4096  ;;  %p1995_p4 = scmp.lt.s32.totalorder %s28_s18, %s28_s18 }
   0x9   :  { %p1991_p3 = scmp.ne.s32.totalorder %s28_s18, %s1990_s26  ;;  %p1996_p5 = scmp.lt.s32.totalorder %s1990_s26, %s1990_s26 }
   0xb   :  { %p1997_p6 = por %p1996_p5, %p1995_p4 }
   0xd   :  { %p1998_p7 = pnand %p1997_p6, %p1991_p3 }
   0xf   :  { %2001 = shalt.err (!%p1998_p7)
}
  0x10   :  { %s2029_s27 = smov 256   ;;  %s2030_s28 = smov 16  }
  0x11   :  { %33 = dma.hbm_to_vmem [thread:$0]  %s2472_s2, 4096, %s28_s18, [#allocation3], %s2029_s27, %s2029_s27, %s2030_s28  }
  0x12   :  { %s2031_s12 = smov [#allocation4]   ;;  %s2002_s16 = scalar_lea.hbm %s2475_s5, 4096 }
  0x13   :  { %s43_s13 = sshll.u32 %s2031_s12, 4  ;;  %p2003_p8 = scmp.ne.s32.totalorder %s2475_s5, %s2002_s16  ;;  %s44_s13 = int_to_ptr.vmem [resolvable:$true] %s43_s13 }
  0x14   :  { %p2006_p9 = scmp.lt.u32.totalorder %s2002_s16, %s2475_s5 }
  0x16   :  { %p2008_p10 = pnand %p2006_p9, %p2003_p8 }
  0x18   :  { %2011 = shalt.err (!%p2008_p10)
}
  0x19   :  { %s2012_s22 = scalar_lea.vmem %s44_s13, 4096  ;;  %p2017_p12 = scmp.lt.s32.totalorder %s44_s13, %s44_s13 }
  0x1a   :  { %p2013_p11 = scmp.ne.s32.totalorder %s44_s13, %s2012_s22  ;;  %p2018_p13 = scmp.lt.s32.totalorder %s2012_s22, %s2012_s22 }
  0x1c   :  { %p2019_p0 = por %p2018_p13, %p2017_p12 }
  0x1e   :  { %p2020_p1 = pnand %p2019_p0, %p2013_p11 }
  0x20   :  { %2023 = shalt.err (!%p2020_p1)
}
  0x21   :  { %s2032_s2 = smov 64   ;;  %s2033_s18 = smov 4  }
  0x22   :  { %49 = dma.hbm_to_vmem [thread:$0]  %s2475_s5, 4096, %s44_s13, [#allocation5], %s2032_s2, %s2032_s2, %s2033_s18  }
  0x23   :  { %2024 = dma.done.wait [#allocation3], 4096  }
  0x24   :  { %2025 = vsyncadd [#allocation3], 4294963200 }
  0x25   :  { %2026 = dma.done.wait [#allocation5], 4096  }
  0x26   :  { %2027 = vsyncadd [#allocation5], 4294963200  ;;  %v2034_v0 = vmov 0   ;;  %v1812_v1 = vld [vmem:[%s2473_s3 + $0x4] ss:$16 sps:$4 sm:$0xff]   ;;  %v116_v6 = vld [vmem:[%s2471_s1 + $0x8] sm:$0xff] }
  0x27   :  { %196 = vmatprep.mubr.bf16.mxu0 %v2034_v0  ;;  %269 = vmatprep.mubr.bf16.mxu1 %v2034_v0  ;;  %v1814_v2 = vld [vmem:[%s2473_s3 + $0xc] ss:$16 sps:$4 sm:$0xff]   ;;  %v1816_v3 = vld [vmem:[%s2473_s3] ss:$16 sps:$4 sm:$0xff]   ;;  %v1817_v4 = vld [vmem:[%s2473_s3 + $0x8] ss:$16 sps:$4 sm:$0xff]  }
  0x28   :  { %164 = vmatprep.subr.bf16.mxu0 %v1812_v1  ;;  %v115_v5 = vld [vmem:[%s2471_s1] sm:$0xff]  ;;  %237 = vmatprep.subr.bf16.mxu1 %v1814_v2  ;;  %vm151_vm0 = vcmask 130048   ;;  %v1821_v10 = vld [vmem:[#allocation2 + $0x8] ss:$16 sps:$4 sm:$0xff]   ;;  %v1823_v11 = vld [vmem:[#allocation2 + $0xc] ss:$16 sps:$4 sm:$0xff]  }
  0x29   :  { %165 = vmatpush1.bf16.msra.mxu0 %v1816_v3  ;;  %238 = vmatpush1.bf16.msra.mxu1 %v1817_v4  ;;  %v123_v7 = vpack.c.bf16 %v116_v6, %v115_v5  ;;  %v1818_v8 = vld [vmem:[#allocation2] ss:$16 sps:$4 sm:$0xff]   ;;  %v1820_v9 = vld [vmem:[#allocation2 + $0x4] ss:$16 sps:$4 sm:$0xff]   ;;  %v1827_v14 = vld [vmem:[#allocation2 + $0x28] ss:$16 sps:$4 sm:$0xff]  }
  0x2a   :  { %470 = vmatprep.subr.bf16.mxu0 %v1820_v9  ;;  %v1824_v12 = vld [vmem:[#allocation2 + $0x20] ss:$16 sps:$4 sm:$0xff]   ;;  %v1826_v13 = vld [vmem:[#allocation2 + $0x24] ss:$16 sps:$4 sm:$0xff]   ;;  %543 = vmatprep.subr.bf16.mxu1 %v1823_v11  ;;  %v1829_v15 = vld [vmem:[#allocation2 + $0x2c] ss:$16 sps:$4 sm:$0xff]  }
  0x2b   :  { %v117_v16 = vld [vmem:[%s2471_s1 + $0x10] sm:$0xff]  ;;  %v118_v17 = vld [vmem:[%s2471_s1 + $0x18] sm:$0xff]  ;;  %v119_v26 = vld [vmem:[%s2471_s1 + $0x20] sm:$0xff] }
  0x2c   :  { %1551 = vmatmul.mubr.msk.bf16.vlgmr.msra.gmra.mrb[0].mxu0 %vm151_vm0, %v123_v7  ;;  %1555 = vmatmul.mubr.msk.bf16.vlgmr.msra.gmra.mrb[0].mxu1 %vm151_vm0, %v123_v7  ;;  %v1832_v18 = vld [vmem:[#allocation2 + $0x44] ss:$16 sps:$4 sm:$0xff]   ;;  %v124_v19 = vpack.c.bf16 %v118_v17, %v117_v16  ;;  %v1830_v20 = vld [vmem:[#allocation2 + $0x40] ss:$16 sps:$4 sm:$0xff]   ;;  %v1835_v21 = vld [vmem:[#allocation2 + $0x4c] ss:$16 sps:$4 sm:$0xff]  }
  0x2d   :  { %471 = vmatpush1.bf16.msra.mxu0 %v1818_v8  ;;  %544 = vmatpush1.bf16.msra.mxu1 %v1821_v10  ;;  %v1833_v22 = vld [vmem:[#allocation2 + $0x48] ss:$16 sps:$4 sm:$0xff]   ;;  %v1838_v23 = vld [vmem:[#allocation2 + $0x64] ss:$16 sps:$4 sm:$0xff]   ;;  %v1841_v24 = vld [vmem:[#allocation2 + $0x6c] ss:$16 sps:$4 sm:$0xff]  }
  0x2e   :  { %472 = vmatprep.subr.bf16.mxu0 %v1826_v13  ;;  %545 = vmatprep.subr.bf16.mxu1 %v1829_v15  ;;  %v1836_v25 = vld [vmem:[#allocation2 + $0x60] ss:$16 sps:$4 sm:$0xff]   ;;  %v120_v27 = vld [vmem:[%s2471_s1 + $0x28] sm:$0xff]  ;;  %v1844_v29 = vld [vmem:[#allocation2 + $0x84] ss:$16 sps:$4 sm:$0xff]  }
  0x2f   :  { %206 = vmatprep.mubr.bf16.mxu0 %v2034_v0  ;;  %279 = vmatprep.mubr.bf16.mxu1 %v2034_v0  ;;  %v1839_v28 = vld [vmem:[#allocation2 + $0x68] ss:$16 sps:$4 sm:$0xff]   ;;  %v1847_v30 = vld [vmem:[#allocation2 + $0x8c] ss:$16 sps:$4 sm:$0xff]   ;;  %v125_v31 = vpack.c.bf16 %v120_v27, %v119_v26  ;;  %v1842_v32 = vld [vmem:[#allocation2 + $0x80] ss:$16 sps:$4 sm:$0xff]  }
  0x30   :  { %v1845_v33 = vld [vmem:[#allocation2 + $0x88] ss:$16 sps:$4 sm:$0xff]   ;;  %v1850_v34 = vld [vmem:[#allocation2 + $0xa4] ss:$16 sps:$4 sm:$0xff]   ;;  %v1848_v35 = vld [vmem:[#allocation2 + $0xa0] ss:$16 sps:$4 sm:$0xff]  }
  0x31   :  { %473 = vmatpush1.bf16.msra.mxu0 %v1824_v12  ;;  %546 = vmatpush1.bf16.msra.mxu1 %v1827_v14  ;;  %v1853_v36 = vld [vmem:[#allocation2 + $0xac] ss:$16 sps:$4 sm:$0xff]   ;;  %v1851_v37 = vld [vmem:[#allocation2 + $0xa8] ss:$16 sps:$4 sm:$0xff]   ;;  %v121_v38 = vld [vmem:[%s2471_s1 + $0x30] sm:$0xff] }
  0x32   :  { %474 = vmatprep.subr.bf16.mxu0 %v1832_v18  ;;  %547 = vmatprep.subr.bf16.mxu1 %v1835_v21  ;;  %v122_v39 = vld [vmem:[%s2471_s1 + $0x38] sm:$0xff]  ;;  %v1856_v40 = vld [vmem:[#allocation2 + $0xc4] ss:$16 sps:$4 sm:$0xff]   ;;  %v1854_v43 = vld [vmem:[#allocation2 + $0xc0] ss:$16 sps:$4 sm:$0xff]  }
  0x33   :  { %v1859_v41 = vld [vmem:[#allocation2 + $0xcc] ss:$16 sps:$4 sm:$0xff]   ;;  %v126_v42 = vpack.c.bf16 %v122_v39, %v121_v38  ;;  %v1857_v44 = vld [vmem:[#allocation2 + $0xc8] ss:$16 sps:$4 sm:$0xff]   ;;  %v1862_v45 = vld [vmem:[#allocation2 + $0xe4] ss:$16 sps:$4 sm:$0xff]  }
  0x34   :  { %1552 = vmatmul.mubr.msk.bf16.gmra.mrb[4].mxu0 %vm151_vm0, %v124_v19  ;;  %1556 = vmatmul.mubr.msk.bf16.gmra.mrb[4].mxu1 %vm151_vm0, %v124_v19  ;;  %v1865_v46 = vld [vmem:[#allocation2 + $0xec] ss:$16 sps:$4 sm:$0xff]   ;;  %v1860_v47 = vld [vmem:[#allocation2 + $0xe0] ss:$16 sps:$4 sm:$0xff]   ;;  %v1863_v50 = vld [vmem:[#allocation2 + $0xe8] ss:$16 sps:$4 sm:$0xff]  }
  0x35   :  { %475 = vmatpush1.bf16.msra.mxu0 %v1830_v20  ;;  %216 = vmatprep.mubr.bf16.mxu0 %v2034_v0  ;;  %v71_v48 = vld [vmem:[%s2470_s0] sm:$0xff]  ;;  %v72_v49 = vld [vmem:[%s2470_s0 + $0x8] sm:$0xff]  ;;  %v73_v52 = vld [vmem:[%s2470_s0 + $0x10] sm:$0xff] }
  0x36   :  { %548 = vmatpush1.bf16.msra.mxu1 %v1833_v22  ;;  %476 = vmatprep.subr.bf16.mxu0 %v1838_v23  ;;  %v79_v51 = vpack.c.bf16 %v72_v49, %v71_v48  ;;  %v74_v53 = vld [vmem:[%s2470_s0 + $0x18] sm:$0xff]  ;;  %v75_v55 = vld [vmem:[%s2470_s0 + $0x20] sm:$0xff]  ;;  %v76_v56 = vld [vmem:[%s2470_s0 + $0x28] sm:$0xff] }
  0x37   :  { %549 = vmatprep.subr.bf16.mxu1 %v1841_v24  ;;  %289 = vmatprep.mubr.bf16.mxu1 %v2034_v0  ;;  %v80_v54 = vpack.c.bf16 %v74_v53, %v73_v52  ;;  %v81_v57 = vpack.c.bf16 %v76_v56, %v75_v55  ;;  %v77_v58 = vld [vmem:[%s2470_s0 + $0x30] sm:$0xff]  ;;  %v78_v59 = vld [vmem:[%s2470_s0 + $0x38] sm:$0xff]  ;;  %v1866_v61 = vld [vmem:[#allocation4 + $0x40] sm:$0xff]  }
  0x38   :  { %v82_v60 = vpack.c.bf16 %v78_v59, %v77_v58  ;;  %v1867_v62 = vld [vmem:[#allocation4 + $0xc0] sm:$0xff]   ;;  %v1870_v2 = vld [vmem:[#allocation4 + $0x48] sm:$0xff]   ;;  %v1875_v6 = vld [vmem:[#allocation4 + $0xd0] sm:$0xff]  }
  0x39   :  { %477 = vmatpush1.bf16.msra.mxu0 %v1836_v25  ;;  %v1868_v63 = vld [vmem:[#allocation4] sm:$0xff]   ;;  %v1871_v3 = vld [vmem:[#allocation4 + $0xc8] sm:$0xff]   ;;  %v1876_v7 = vld [vmem:[#allocation4 + $0x10] sm:$0xff]  }
  0x3a   :  { %550 = vmatpush1.bf16.msra.mxu1 %v1839_v28  ;;  %478 = vmatprep.subr.bf16.mxu0 %v1844_v29  ;;  %v1869_v1 = vld [vmem:[#allocation4 + $0x80] sm:$0xff]   ;;  %v1872_v4 = vld [vmem:[#allocation4 + $0x8] sm:$0xff]   ;;  %v1877_v8 = vld [vmem:[#allocation4 + $0x90] sm:$0xff]   ;;  %v618_v29 = vlaneseq }
  0x3b   :  { %551 = vmatprep.subr.bf16.mxu1 %v1847_v30  ;;  %v1873_v5 = vld [vmem:[#allocation4 + $0x88] sm:$0xff]   ;;  %v1878_v9 = vld [vmem:[#allocation4 + $0x58] sm:$0xff]   ;;  %v1882_v13 = vld [vmem:[#allocation4 + $0x60] sm:$0xff]  }
  0x3c   :  { %1553 = vmatmul.mubr.msk.bf16.gmra.mrb[8].mxu0 %vm151_vm0, %v125_v31  ;;  %1557 = vmatmul.mubr.msk.bf16.gmra.mrb[8].mxu1 %vm151_vm0, %v125_v31  ;;  %v1879_v10 = vld [vmem:[#allocation4 + $0xd8] sm:$0xff]   ;;  %v1883_v14 = vld [vmem:[#allocation4 + $0xe0] sm:$0xff]   ;;  %v1886_v17 = vld [vmem:[#allocation4 + $0x68] sm:$0xff]   ;;  %v619_v30 = vshrl.u32 %v618_v29, 7 }
  0x3d   :  { %479 = vmatpush1.bf16.msra.mxu0 %v1842_v32  ;;  %226 = vmatprep.mubr.bf16.mxu0 %v2034_v0  ;;  %v1880_v11 = vld [vmem:[#allocation4 + $0x18] sm:$0xff]   ;;  %v1884_v15 = vld [vmem:[#allocation4 + $0x20] sm:$0xff]   ;;  %v1887_v18 = vld [vmem:[#allocation4 + $0xe8] sm:$0xff]  }
  0x3e   :  { %552 = vmatpush1.bf16.msra.mxu1 %v1845_v33  ;;  %480 = vmatprep.subr.bf16.mxu0 %v1850_v34  ;;  %v1881_v12 = vld [vmem:[#allocation4 + $0x98] sm:$0xff]   ;;  %v1885_v16 = vld [vmem:[#allocation4 + $0xa0] sm:$0xff]   ;;  %v1888_v19 = vld [vmem:[#allocation4 + $0x28] sm:$0xff]   ;;  %v2203_v31 = vsub.s32 0, %v619_v30  ;;  %v628_v33 = vsub.s32 2, %v619_v30  ;;  %v624_v34 = vsub.s32 1, %v619_v30 }
  0x3f   :  { %553 = vmatprep.subr.bf16.mxu1 %v1853_v36  ;;  %299 = vmatprep.mubr.bf16.mxu1 %v2034_v0  ;;  %v1889_v20 = vld [vmem:[#allocation4 + $0xa8] sm:$0xff]   ;;  %v1890_v21 = vld [vmem:[#allocation4 + $0x70] sm:$0xff]   ;;  %v1894_v25 = vld [vmem:[#allocation4 + $0x78] sm:$0xff]  }
  0x40   :  { %v1891_v22 = vld [vmem:[#allocation4 + $0xf0] sm:$0xff]   ;;  %v1895_v26 = vld [vmem:[#allocation4 + $0xf8] sm:$0xff]   ;;  %v616_v32 = vld [vmem:[%s2474_s4] sm:$0xf] }
  0x41   :  { %481 = vmatpush1.bf16.msra.mxu0 %v1848_v35  ;;  %v1892_v23 = vld [vmem:[#allocation4 + $0x30] sm:$0xff]   ;;  %v1896_v27 = vld [vmem:[#allocation4 + $0x38] sm:$0xff]   ;;  %v632_v35 = vsub.s32 3, %v619_v30  ;;  %v2209_v36 = vrot.slane %v616_v32, %v2203_v31  ;;  %v2211_v38 = vrot.slane %v616_v32, %v628_v33  ;;  %v2213_v39 = vrot.slane %v616_v32, %v624_v34 }
  0x42   :  { %554 = vmatpush1.bf16.msra.mxu1 %v1851_v37  ;;  %482 = vmatprep.subr.bf16.mxu0 %v1856_v40  ;;  %v1893_v24 = vld [vmem:[#allocation4 + $0xb0] sm:$0xff]   ;;  %v1897_v28 = vld [vmem:[#allocation4 + $0xb8] sm:$0xff]  }
  0x43   :  { %555 = vmatprep.subr.bf16.mxu1 %v1859_v41 }
  0x44   :  { %1554 = vmatmul.mubr.msk.bf16.gmra.mrb[12].mxu0 %vm151_vm0, %v126_v42  ;;  %1558 = vmatmul.mubr.msk.bf16.gmra.mrb[12].mxu1 %vm151_vm0, %v126_v42  ;;  %v2215_v42 = vrot.slane %v616_v32, %v632_v35 }
  0x45   :  { %483 = vmatpush1.bf16.msra.mxu0 %v1854_v43  ;;  %502 = vmatprep.mubr.bf16.mxu0 %v2034_v0 }
  0x46   :  { %556 = vmatpush1.bf16.msra.mxu1 %v1857_v44  ;;  %484 = vmatprep.subr.bf16.mxu0 %v1862_v45 }
  0x47   :  { %557 = vmatprep.subr.bf16.mxu1 %v1865_v46  ;;  %575 = vmatprep.mubr.bf16.mxu1 %v2034_v0 }
  0x49   :  { %485 = vmatpush1.bf16.msra.mxu0 %v1860_v47 }
  0x4a   :  { %558 = vmatpush1.bf16.msra.mxu1 %v1863_v50  ;;  %1641 = vmatprep.subr.bf16.mxu0 %v1866_v61 }
  0x4b   :  { %1681 = vmatprep.subr.bf16.mxu1 %v1867_v62 }
  0x4c   :  { %503 = vmatmul.mubr.bf16.vlgmr.msra.gmra.mrb[0].mxu0 %v79_v51 }
  0x4d   :  { %576 = vmatmul.mubr.bf16.vlgmr.msra.gmra.mrb[0].mxu1 %v79_v51  ;;  %512 = vmatprep.mubr.bf16.mxu0 %v2034_v0 }
  0x4e   :  { %585 = vmatprep.mubr.bf16.mxu1 %v2034_v0  ;;  %1642 = vmatpush3.bf16.msra.mxu0 %v1868_v63 }
  0x4f   :  { %1682 = vmatpush3.bf16.msra.mxu1 %v1869_v1  ;;  %1643 = vmatprep.subr.bf16.mxu0 %v1870_v2 }
  0x50   :  { %1683 = vmatprep.subr.bf16.mxu1 %v1871_v3 }
  0x52   :  { %1644 = vmatpush3.bf16.msra.mxu0 %v1872_v4 }
  0x53   :  { %1684 = vmatpush3.bf16.msra.mxu1 %v1873_v5 }
  0x54   :  { %513 = vmatmul.mubr.bf16.gmra.mrb[4].mxu0 %v80_v54  ;;  %1685 = vmatprep.subr.bf16.mxu1 %v1875_v6 }
  0x55   :  { %586 = vmatmul.mubr.bf16.gmra.mrb[4].mxu1 %v80_v54  ;;  %522 = vmatprep.mubr.bf16.mxu0 %v2034_v0 }
  0x56   :  { %595 = vmatprep.mubr.bf16.mxu1 %v2034_v0 }
  0x57   :  { %1686 = vmatpush3.bf16.msra.mxu1 %v1877_v8 }
  0x58   :  { %1687 = vmatprep.subr.bf16.mxu1 %v1879_v10 }
  0x5b   :  { %1688 = vmatpush3.bf16.msra.mxu1 %v1881_v12 }
  0x5c   :  { %523 = vmatmul.mubr.bf16.gmra.mrb[8].mxu0 %v81_v57  ;;  %1689 = vmatprep.subr.bf16.mxu1 %v1883_v14 }
  0x5d   :  { %596 = vmatmul.mubr.bf16.gmra.mrb[8].mxu1 %v81_v57  ;;  %532 = vmatprep.mubr.bf16.mxu0 %v2034_v0 }
  0x5e   :  { %605 = vmatprep.mubr.bf16.mxu1 %v2034_v0  ;;  %v1874_v0 = vld [vmem:[#allocation4 + $0x50] sm:$0xff]  }
  0x5f   :  { %1645 = vmatprep.subr.bf16.mxu0 %v1874_v0  ;;  %1690 = vmatpush3.bf16.msra.mxu1 %v1885_v16 }
  0x60   :  { %1646 = vmatpush3.bf16.msra.mxu0 %v1876_v7  ;;  %1691 = vmatprep.subr.bf16.mxu1 %v1887_v18 }
  0x61   :  { %1647 = vmatprep.subr.bf16.mxu0 %v1878_v9 }
  0x63   :  { %1692 = vmatpush3.bf16.msra.mxu1 %v1889_v20 }
  0x64   :  { %533 = vmatmul.mubr.bf16.gmra.mrb[12].mxu0 %v82_v60  ;;  %1693 = vmatprep.subr.bf16.mxu1 %v1891_v22 }
  0x65   :  { %606 = vmatmul.mubr.bf16.gmra.mrb[12].mxu1 %v82_v60  ;;  %1648 = vmatpush3.bf16.msra.mxu0 %v1880_v11 }
  0x66   :  { %1649 = vmatprep.subr.bf16.mxu0 %v1882_v13 }
  0x67   :  { %1694 = vmatpush3.bf16.msra.mxu1 %v1893_v24 }
  0x68   :  { %1695 = vmatprep.subr.bf16.mxu1 %v1895_v26 }
  0x69   :  { %1650 = vmatpush3.bf16.msra.mxu0 %v1884_v15 }
  0x6a   :  { %1651 = vmatprep.subr.bf16.mxu0 %v1886_v17 }
  0x6b   :  { %1696 = vmatpush3.bf16.msra.mxu1 %v1897_v28 }
  0x6d   :  { %1652 = vmatpush3.bf16.msra.mxu0 %v1888_v19 }
  0x6e   :  { %1653 = vmatprep.subr.bf16.mxu0 %v1890_v21 }
  0x71   :  { %1654 = vmatpush3.bf16.msra.mxu0 %v1892_v23 }
  0x72   :  { %1655 = vmatprep.subr.bf16.mxu0 %v1894_v25 }
  0x75   :  { %1656 = vmatpush3.bf16.msra.mxu0 %v1896_v27 }
 0x11f   :  { %v504_v37 = vpop.f32.mrb[0].mxu0 }
 0x120   :  { %v577_v40 = vpop.f32.mrb[0].mxu1  ;;  %v506_v41 = vpop.f32.mrb[1].mxu0  ;;  %v638_v45 = vadd.f32 %v2209_v36, %v504_v37 }
 0x121   :  { %v579_v43 = vpop.f32.mrb[1].mxu1  ;;  %v508_v44 = vpop.f32.mrb[2].mxu0  ;;  %v640_v49 = vadd.f32 %v2211_v38, %v577_v40  ;;  %v639_v50 = vadd.f32 %v2213_v39, %v506_v41 }
 0x122   :  { %v642_v46 = vadd.f32 %v2209_v36, %v508_v44  ;;  %v581_v47 = vpop.f32.mrb[2].mxu1  ;;  %v510_v48 = vpop.f32.mrb[3].mxu0  ;;  %v641_v54 = vadd.f32 %v2215_v42, %v579_v43 }
 0x123   :  { %v644_v51 = vadd.f32 %v2211_v38, %v581_v47  ;;  %v643_v52 = vadd.f32 %v2213_v39, %v510_v48  ;;  %v583_v53 = vpop.f32.mrb[3].mxu1 }
 0x124   :  { %v2224_v55 = vpack.c.bf16 %v642_v46, %v638_v45  ;;  %v645_v56 = vadd.f32 %v2215_v42, %v583_v53 }
 0x125   :  { %v2227_v57 = vpack.c.bf16 %v644_v51, %v640_v49  ;;  %v2229_v58 = vpack.c.bf16 %v643_v52, %v639_v50 }
 0x126   :  { %v702_v59 = vmul.bf16 1027030327, %v2224_v55  ;;  %v2232_v60 = vpack.c.bf16 %v645_v56, %v641_v54  ;;  %v686_v61 = vmul.bf16 1061961548, %v2224_v55  ;;  %v766_v45 = vmul.bf16 1056980736, %v2224_v55 }
 0x127   :  { %v704_v62 = vmul.bf16 1027030327, %v2227_v57  ;;  %v688_v1 = vmul.bf16 1061961548, %v2227_v57  ;;  %v687_v2 = vmul.bf16 1061961548, %v2229_v58 }
 0x128   :  { %v718_v63 = vmul.bf16 %v702_v59, %v2224_v55  ;;  %v703_v3 = vmul.bf16 1027030327, %v2229_v58  ;;  %v689_v5 = vmul.bf16 1061961548, %v2232_v60  ;;  %v705_v0 = vmul.bf16 1027030327, %v2232_v60 }
 0x129   :  { %v720_v4 = vmul.bf16 %v704_v62, %v2227_v57  ;;  %v514_v6 = vpop.f32.mrb[4].mxu0  ;;  %v587_v7 = vpop.f32.mrb[4].mxu1  ;;  %v768_v49 = vmul.bf16 1056980736, %v2227_v57  ;;  %v767_v54 = vmul.bf16 1056980736, %v2229_v58 }
 0x12a   :  { %v734_v8 = vadd.bf16 1065369472, %v718_v63  ;;  %v719_v9 = vmul.bf16 %v703_v3, %v2229_v58  ;;  %v646_v10 = vadd.f32 %v2209_v36, %v514_v6  ;;  %v648_v11 = vadd.f32 %v2211_v38, %v587_v7  ;;  %v516_v12 = vpop.f32.mrb[5].mxu0  ;;  %v589_v13 = vpop.f32.mrb[5].mxu1 }
 0x12b   :  { %v736_v14 = vadd.bf16 1065369472, %v720_v4  ;;  %v721_v15 = vmul.bf16 %v705_v0, %v2232_v60  ;;  %v647_v16 = vadd.f32 %v2213_v39, %v516_v12  ;;  %v649_v17 = vadd.f32 %v2215_v42, %v589_v13  ;;  %v518_v18 = vpop.f32.mrb[6].mxu0  ;;  %v591_v19 = vpop.f32.mrb[6].mxu1 }
 0x12c   :  { %v750_v20 = vmul.bf16 %v734_v8, %v686_v61  ;;  %v735_v21 = vadd.bf16 1065369472, %v719_v9  ;;  %v650_v22 = vadd.f32 %v2209_v36, %v518_v18  ;;  %v652_v23 = vadd.f32 %v2211_v38, %v591_v19  ;;  %v520_v24 = vpop.f32.mrb[7].mxu0  ;;  %v593_v25 = vpop.f32.mrb[7].mxu1 }
 0x12d   :  { %v752_v26 = vmul.bf16 %v736_v14, %v688_v1  ;;  %v737_v27 = vadd.bf16 1065369472, %v721_v15  ;;  %v651_v28 = vadd.f32 %v2213_v39, %v520_v24  ;;  %v653_v29 = vadd.f32 %v2215_v42, %v593_v25 }
 0x12e   :  { %1906 = vtanh.bf16 %v750_v20  ;;  %v2253_v30 = vpack.c.bf16 %v650_v22, %v646_v10  ;;  %v2255_v32 = vpack.c.bf16 %v652_v23, %v648_v11  ;;  %v751_v33 = vmul.bf16 %v735_v21, %v687_v2 }
 0x12f   :  { %1908 = vtanh.bf16 %v752_v26  ;;  %v2257_v34 = vpack.c.bf16 %v651_v28, %v647_v16  ;;  %v2259_v35 = vpack.c.bf16 %v653_v29, %v649_v17  ;;  %v524_v37 = vpop.f32.mrb[8].mxu0  ;;  %v753_v40 = vmul.bf16 %v737_v27, %v689_v5 }
 0x130   :  { %v706_v41 = vmul.bf16 1027030327, %v2253_v30  ;;  %v708_v43 = vmul.bf16 1027030327, %v2255_v32  ;;  %1910 = vtanh.bf16 %v751_v33  ;;  %v597_v47 = vpop.f32.mrb[8].mxu1  ;;  %v526_v48 = vpop.f32.mrb[9].mxu0  ;;  %v654_v51 = vadd.f32 %v2209_v36, %v524_v37 }
 0x131   :  { %v707_v44 = vmul.bf16 1027030327, %v2257_v34  ;;  %v709_v46 = vmul.bf16 1027030327, %v2259_v35  ;;  %1912 = vtanh.bf16 %v753_v40  ;;  %v599_v52 = vpop.f32.mrb[9].mxu1  ;;  %v528_v53 = vpop.f32.mrb[10].mxu0  ;;  %v656_v61 = vadd.f32 %v2211_v38, %v597_v47 }
 0x132   :  { %v2271_v56 = vmul.bf16 %v706_v41, %v2253_v30  ;;  %v2274_v59 = vmul.bf16 %v708_v43, %v2255_v32  ;;  %v658_v62 = vadd.f32 %v2209_v36, %v528_v53  ;;  %v601_v63 = vpop.f32.mrb[10].mxu1  ;;  %v530_v1 = vpop.f32.mrb[11].mxu0  ;;  %v655_v3 = vadd.f32 %v2213_v39, %v526_v48 }
 0x133   :  { %v723_v50 = vmul.bf16 %v707_v44, %v2257_v34  ;;  %v2279_v2 = vmul.bf16 %v709_v46, %v2259_v35  ;;  %v660_v4 = vadd.f32 %v2211_v38, %v601_v63  ;;  %v659_v5 = vadd.f32 %v2213_v39, %v530_v1  ;;  %v603_v0 = vpop.f32.mrb[11].mxu1 }
 0x134   :  { %v657_v7 = vadd.f32 %v2215_v42, %v599_v52  ;;  %v2285_v8 = vpack.c.bf16 %v658_v62, %v654_v51  ;;  %v661_v9 = vadd.f32 %v2215_v42, %v603_v0  ;;  %v690_v10 = vmul.bf16 1061961548, %v2253_v30 }
 0x135   :  { %v739_v6 = vadd.bf16 1065369472, %v723_v50  ;;  %v692_v11 = vmul.bf16 1061961548, %v2255_v32  ;;  %v2290_v12 = vpack.c.bf16 %v660_v4, %v656_v61  ;;  %v2292_v13 = vpack.c.bf16 %v659_v5, %v655_v3 }
 0x136   :  { %v691_v15 = vmul.bf16 1061961548, %v2257_v34  ;;  %v710_v16 = vmul.bf16 1027030327, %v2285_v8  ;;  %v2296_v17 = vpack.c.bf16 %v661_v9, %v657_v7  ;;  %v738_v21 = vadd.bf16 1065369472, %v2271_v56 }
 0x137   :  { %v534_v14 = vpop.f32.mrb[12].mxu0  ;;  %v740_v22 = vadd.bf16 1065369472, %v2274_v59  ;;  %v693_v23 = vmul.bf16 1061961548, %v2259_v35 }
 0x138   :  { %v607_v18 = vpop.f32.mrb[12].mxu1  ;;  %v536_v19 = vpop.f32.mrb[13].mxu0  ;;  %v741_v25 = vadd.bf16 1065369472, %v2279_v2  ;;  %v711_v26 = vmul.bf16 1027030327, %v2292_v13  ;;  %v755_v28 = vmul.bf16 %v739_v6, %v691_v15  ;;  %v662_v37 = vadd.f32 %v2209_v36, %v534_v14 }
 0x139   :  { %v1907_v20 = vpop.eup %1906  ;;  %v769_v27 = vmul.bf16 1056980736, %v2232_v60  ;;  %v694_v29 = vmul.bf16 1061961548, %v2285_v8  ;;  %v712_v33 = vmul.bf16 1027030327, %v2290_v12  ;;  %v664_v40 = vadd.f32 %v2211_v38, %v607_v18 }
 0x13a   :  { %v1909_v24 = vpop.eup %1908  ;;  %v609_v41 = vpop.f32.mrb[13].mxu1  ;;  %v726_v46 = vmul.bf16 %v710_v16, %v2285_v8  ;;  %v713_v47 = vmul.bf16 1027030327, %v2296_v17  ;;  %v663_v48 = vadd.f32 %v2213_v39, %v536_v19  ;;  %v798_v51 = vadd.bf16 1065369472, %v1907_v20 }
 0x13b   :  { %v538_v43 = vpop.f32.mrb[14].mxu0  ;;  %v1911_v44 = vpop.eup %1910  ;;  %v800_v63 = vadd.bf16 1065369472, %v1909_v24  ;;  %v727_v1 = vmul.bf16 %v711_v26, %v2292_v13  ;;  %v665_v2 = vadd.f32 %v2215_v42, %v609_v41  ;;  %v728_v14 = vmul.bf16 %v712_v33, %v2290_v12 }
 0x13c   :  { %v611_v50 = vpop.f32.mrb[14].mxu1  ;;  %v540_v60 = vpop.f32.mrb[15].mxu0  ;;  %v666_v53 = vadd.f32 %v2209_v36, %v538_v43  ;;  %v799_v4 = vadd.bf16 1065369472, %v1911_v44  ;;  %v814_v16 = vmul.bf16 %v798_v51, %v766_v45  ;;  %1914 = vtanh.bf16 %v755_v28 }
 0x13d   :  { %v1913_v52 = vpop.eup %1912  ;;  %v668_v56 = vadd.f32 %v2211_v38, %v611_v50  ;;  %v667_v61 = vadd.f32 %v2213_v39, %v540_v60  ;;  %v613_v62 = vpop.f32.mrb[15].mxu1  ;;  %v696_v38 = vmul.bf16 1061961548, %v2290_v12  ;;  %v729_v39 = vmul.bf16 %v713_v47, %v2296_v17 }
 0x13e   :  { %v669_v3 = vadd.f32 %v2215_v42, %v613_v62  ;;  %v2317_v5 = vpack.c.bf16 %v666_v53, %v662_v37  ;;  %v801_v36 = vadd.bf16 1065369472, %v1913_v52  ;;  %v815_v9 = vmul.bf16 %v799_v4, %v767_v54 }
 0x13f   :  { %v2319_v0 = vpack.c.bf16 %v668_v56, %v664_v40  ;;  %v2321_v6 = vpack.c.bf16 %v667_v61, %v663_v48  ;;  %v695_v42 = vmul.bf16 1061961548, %v2292_v13  ;;  %v816_v20 = vmul.bf16 %v800_v63, %v768_v49 }
 0x140   :  { %v2325_v7 = vpack.c.bf16 %v669_v3, %v665_v2  ;;  %v817_v15 = vmul.bf16 %v801_v36, %v769_v27  ;;  %v714_v18 = vmul.bf16 1027030327, %v2317_v5  ;;  %1125 = vmatprep.mubr.bf16.mxu0 %v815_v9  ;;  %v742_v24 = vadd.bf16 1065369472, %v726_v46 }
 0x141   :  { %v715_v19 = vmul.bf16 1027030327, %v2321_v6  ;;  %v743_v58 = vadd.bf16 1065369472, %v727_v1  ;;  %1126 = vmatmul.mubr.bf16.vlgmr.msra.gmra.mrb[16].mxu0 %v814_v16  ;;  %v757_v26 = vmul.bf16 %v741_v25, %v693_v23  ;;  %v745_v27 = vadd.bf16 1065369472, %v729_v39 }
 0x142   :  { %v717_v54 = vmul.bf16 1027030327, %v2325_v7  ;;  %1190 = vmatprep.mubr.bf16.mxu1 %v817_v15  ;;  %v716_v55 = vmul.bf16 1027030327, %v2319_v0  ;;  %v754_v33 = vmul.bf16 %v738_v21, %v690_v10  ;;  %v744_v37 = vadd.bf16 1065369472, %v728_v14 }
 0x143   :  { %v731_v45 = vmul.bf16 %v715_v19, %v2321_v6  ;;  %1191 = vmatmul.mubr.bf16.vlgmr.msra.gmra.mrb[16].mxu1 %v816_v20  ;;  %v697_v57 = vmul.bf16 1061961548, %v2296_v17  ;;  %1916 = vtanh.bf16 %v757_v26  ;;  %v730_v28 = vmul.bf16 %v714_v18, %v2317_v5 }
 0x144   :  { %v733_v49 = vmul.bf16 %v717_v54, %v2325_v7  ;;  %1918 = vtanh.bf16 %v754_v33  ;;  %v756_v23 = vmul.bf16 %v740_v22, %v692_v11  ;;  %v699_v25 = vmul.bf16 1061961548, %v2321_v6 }
 0x145   :  { %v747_v40 = vadd.bf16 1065369472, %v731_v45  ;;  %v701_v41 = vmul.bf16 1061961548, %v2325_v7  ;;  %v759_v21 = vmul.bf16 %v743_v58, %v695_v42  ;;  %v732_v43 = vmul.bf16 %v716_v55, %v2319_v0 }
 0x146   :  { %v749_v10 = vadd.bf16 1065369472, %v733_v49  ;;  %1920 = vtanh.bf16 %v756_v23  ;;  %v761_v44 = vmul.bf16 %v745_v27, %v697_v57  ;;  %v758_v46 = vmul.bf16 %v742_v24, %v694_v29 }
 0x147   :  { %1922 = vtanh.bf16 %v759_v21  ;;  %v760_v47 = vmul.bf16 %v744_v37, %v696_v38  ;;  %v746_v48 = vadd.bf16 1065369472, %v730_v28  ;;  %v763_v50 = vmul.bf16 %v747_v40, %v699_v25  ;;  %v1915_v60 = vpop.eup %1914 }
 0x148   :  { %1924 = vtanh.bf16 %v761_v44  ;;  %v765_v59 = vmul.bf16 %v749_v10, %v701_v41  ;;  %v698_v11 = vmul.bf16 1061961548, %v2317_v5  ;;  %v748_v22 = vadd.bf16 1065369472, %v732_v43  ;;  %v1899_v43 = vld [vmem:[%s2479_s9 + $0x8] sm:$0xff]   ;;  %v1902_v44 = vld [vmem:[%s2479_s9 + $0x20] sm:$0xff]  }
 0x149   :  { %1926 = vtanh.bf16 %v758_v46  ;;  %v771_v51 = vmul.bf16 1056980736, %v2257_v34  ;;  %v700_v52 = vmul.bf16 1061961548, %v2319_v0  ;;  %v803_v53 = vadd.bf16 1065369472, %v1915_v60 }
 0x14a   :  { %1928 = vtanh.bf16 %v760_v47  ;;  %v762_v29 = vmul.bf16 %v746_v48, %v698_v11  ;;  %v773_v1 = vmul.bf16 1056980736, %v2259_v35  ;;  %v770_v3 = vmul.bf16 1056980736, %v2253_v30  ;;  %v1903_v46 = vld [vmem:[%s2479_s9 + $0x28] sm:$0xff]   ;;  %v1904_v47 = vld [vmem:[%s2479_s9 + $0x30] sm:$0xff]  }
 0x14b   :  { %1930 = vtanh.bf16 %v763_v50  ;;  %v819_v61 = vmul.bf16 %v803_v53, %v771_v51  ;;  %v764_v62 = vmul.bf16 %v748_v22, %v700_v52  ;;  %v772_v9 = vmul.bf16 1056980736, %v2255_v32  ;;  %v1905_v48 = vld [vmem:[%s2479_s9 + $0x38] sm:$0xff]   ;;  %v2395_v11 = vld [vmem:[%s2476_s6] ss:$0 sm:$0xff] }
 0x14c   :  { %1932 = vtanh.bf16 %v765_v59  ;;  %v775_v15 = vmul.bf16 1056980736, %v2292_v13  ;;  %v777_v30 = vmul.bf16 1056980736, %v2296_v17  ;;  %v779_v27 = vmul.bf16 1056980736, %v2321_v6 }
 0x14d   :  { %1133 = vmatprep.mubr.bf16.mxu0 %v819_v61  ;;  %1934 = vtanh.bf16 %v762_v29  ;;  %v774_v13 = vmul.bf16 1056980736, %v2285_v8  ;;  %v781_v17 = vmul.bf16 1056980736, %v2325_v7  ;;  %v776_v49 = vmul.bf16 1056980736, %v2290_v12 }
 0x14e   :  { %v1917_v56 = vpop.eup %1916  ;;  %1936 = vtanh.bf16 %v764_v62  ;;  %v778_v41 = vmul.bf16 1056980736, %v2317_v5  ;;  %v780_v21 = vmul.bf16 1056980736, %v2319_v0  ;;  %v1898_v12 = vld [vmem:[%s2479_s9] sm:$0xff]   ;;  %v1900_v5 = vld [vmem:[%s2479_s9 + $0x10] sm:$0xff]  }
 0x14f   :  { %v1919_v63 = vpop.eup %1918  ;;  %v805_v2 = vadd.bf16 1065369472, %v1917_v56  ;;  %1733 = vmatprep.subr.bf16.mxu0 %v1898_v12  ;;  %1757 = vmatprep.subr.bf16.mxu1 %v1898_v12  ;;  %v1901_v0 = vld [vmem:[%s2479_s9 + $0x18] sm:$0xff]  }
 0x150   :  { %v802_v4 = vadd.bf16 1065369472, %v1919_v63  ;;  %1734 = vmatpush3.bf16.msra.mxu0 %v1898_v12  ;;  %1765 = vmatpush3.bf16.msra.mxu1 %v1898_v12 }
 0x151   :  { %v1921_v36 = vpop.eup %1920  ;;  %v821_v34 = vmul.bf16 %v805_v2, %v773_v1  ;;  %1735 = vmatprep.subr.bf16.mxu0 %v1899_v43  ;;  %1758 = vmatprep.subr.bf16.mxu1 %v1899_v43 }
 0x152   :  { %v1923_v38 = vpop.eup %1922  ;;  %v818_v39 = vmul.bf16 %v802_v4, %v770_v3  ;;  %v804_v14 = vadd.bf16 1065369472, %v1921_v36 }
 0x153   :  { %v1925_v42 = vpop.eup %1924  ;;  %1198 = vmatprep.mubr.bf16.mxu1 %v821_v34  ;;  %v807_v16 = vadd.bf16 1065369472, %v1923_v38 }
 0x154   :  { %v1927_v35 = vpop.eup %1926  ;;  %1134 = vmatmul.mubr.bf16.gmra.mrb[20].mxu0 %v818_v39  ;;  %v820_v18 = vmul.bf16 %v804_v14, %v772_v9  ;;  %v809_v19 = vadd.bf16 1065369472, %v1925_v42  ;;  %1766 = vmatpush3.bf16.msra.mxu1 %v1899_v43 }
 0x155   :  { %v1929_v20 = vpop.eup %1928  ;;  %v823_v24 = vmul.bf16 %v807_v16, %v775_v15  ;;  %v806_v26 = vadd.bf16 1065369472, %v1927_v35  ;;  %1736 = vmatpush3.bf16.msra.mxu0 %v1899_v43  ;;  %1759 = vmatprep.subr.bf16.mxu1 %v1900_v5 }
 0x156   :  { %v1931_v58 = vpop.eup %1930  ;;  %1199 = vmatmul.mubr.bf16.gmra.mrb[20].mxu1 %v820_v18  ;;  %v825_v54 = vmul.bf16 %v809_v19, %v777_v30  ;;  %v808_v45 = vadd.bf16 1065369472, %v1929_v20  ;;  %1737 = vmatprep.subr.bf16.mxu0 %v1900_v5 }
 0x157   :  { %v1933_v32 = vpop.eup %1932  ;;  %1141 = vmatprep.mubr.bf16.mxu0 %v823_v24  ;;  %v811_v55 = vadd.bf16 1065369472, %v1931_v58  ;;  %v822_v57 = vmul.bf16 %v806_v26, %v774_v13 }
 0x158   :  { %1206 = vmatprep.mubr.bf16.mxu1 %v825_v54  ;;  %v813_v33 = vadd.bf16 1065369472, %v1933_v32  ;;  %v1935_v28 = vpop.eup %1934  ;;  %v824_v23 = vmul.bf16 %v808_v45, %v776_v49  ;;  %1767 = vmatpush3.bf16.msra.mxu1 %v1900_v5 }
 0x159   :  { %v827_v37 = vmul.bf16 %v811_v55, %v779_v27  ;;  %v1937_v25 = vpop.eup %1936  ;;  %v810_v6 = vadd.bf16 1065369472, %v1935_v28  ;;  %1738 = vmatpush3.bf16.msra.mxu0 %v1900_v5  ;;  %1760 = vmatprep.subr.bf16.mxu1 %v1901_v0 }
 0x15a   :  { %v829_v40 = vmul.bf16 %v813_v33, %v781_v17  ;;  %v812_v8 = vadd.bf16 1065369472, %v1937_v25  ;;  %1739 = vmatprep.subr.bf16.mxu0 %v1901_v0 }
 0x15b   :  { %v826_v10 = vmul.bf16 %v810_v6, %v778_v41 }
 0x15c   :  { %1142 = vmatmul.mubr.bf16.gmra.mrb[24].mxu0 %v822_v57  ;;  %v828_v7 = vmul.bf16 %v812_v8, %v780_v21  ;;  %1768 = vmatpush3.bf16.msra.mxu1 %v1901_v0 }
 0x15d   :  { %1149 = vmatprep.mubr.bf16.mxu0 %v827_v37  ;;  %1740 = vmatpush3.bf16.msra.mxu0 %v1901_v0 }
 0x15e   :  { %1207 = vmatmul.mubr.bf16.gmra.mrb[24].mxu1 %v824_v23  ;;  %1741 = vmatprep.subr.bf16.mxu0 %v1902_v44 }
 0x15f   :  { %1214 = vmatprep.mubr.bf16.mxu1 %v829_v40  ;;  %1761 = vmatprep.subr.bf16.mxu1 %v1902_v44 }
 0x160   :  { %1769 = vmatpush3.bf16.msra.mxu1 %v1902_v44 }
 0x161   :  { %1742 = vmatpush3.bf16.msra.mxu0 %v1902_v44  ;;  %1762 = vmatprep.subr.bf16.mxu1 %v1903_v46 }
 0x162   :  { %1743 = vmatprep.subr.bf16.mxu0 %v1903_v46 }
 0x164   :  { %1150 = vmatmul.mubr.bf16.gmra.mrb[28].mxu0 %v826_v10  ;;  %1770 = vmatpush3.bf16.msra.mxu1 %v1903_v46 }
 0x165   :  { %1744 = vmatpush3.bf16.msra.mxu0 %v1903_v46  ;;  %1763 = vmatprep.subr.bf16.mxu1 %v1904_v47 }
 0x166   :  { %1215 = vmatmul.mubr.bf16.gmra.mrb[28].mxu1 %v828_v7  ;;  %1745 = vmatprep.subr.bf16.mxu0 %v1904_v47 }
 0x168   :  { %1771 = vmatpush3.bf16.msra.mxu1 %v1904_v47 }
 0x169   :  { %1746 = vmatpush3.bf16.msra.mxu0 %v1904_v47  ;;  %1764 = vmatprep.subr.bf16.mxu1 %v1905_v48 }
 0x16a   :  { %1747 = vmatprep.subr.bf16.mxu0 %v1905_v48 }
 0x16c   :  { %1772 = vmatpush3.bf16.msra.mxu1 %v1905_v48 }
 0x16d   :  { %1748 = vmatpush3.bf16.msra.mxu0 %v1905_v48 }
 0x214   :  { %v1657_v50 = vpop.f32.mrb[16].mxu0 }
 0x215   :  { %v1658_v22 = vpop.f32.mrb[17].mxu0 }
 0x216   :  { %v1697_v59 = vpop.f32.mrb[16].mxu1  ;;  %v1659_v60 = vadd.f32 %v1658_v22, %v1657_v50  ;;  %v1660_v52 = vpop.f32.mrb[18].mxu0 }
 0x217   :  { %v1698_v51 = vpop.f32.mrb[17].mxu1  ;;  %v1661_v56 = vpop.f32.mrb[19].mxu0 }
 0x218   :  { %v1699_v53 = vadd.f32 %v1698_v51, %v1697_v59  ;;  %v1700_v29 = vpop.f32.mrb[18].mxu1  ;;  %v1128_v61 = vadd.f32 %v1659_v60, %v2395_v11  ;;  %v1662_v62 = vadd.f32 %v1661_v56, %v1660_v52 }
 0x219   :  { %v1701_v63 = vpop.f32.mrb[19].mxu1 }
 0x21a   :  { %v1702_v1 = vadd.f32 %v1701_v63, %v1700_v29  ;;  %v1193_v2 = vadd.f32 %v1699_v53, %v1128_v61  ;;  %v1131_v3 = vadd.f32 %v1662_v62, %v2395_v11 }
 0x21c   :  { %v1196_v4 = vadd.f32 %v1702_v1, %v1131_v3 }
 0x21e   :  { %v2399_v36 = vpack.c.bf16 %v1196_v4, %v1193_v2 }
 0x220   :  { %v1231_v34 = vmul.bf16 1027030327, %v2399_v36  ;;  %v1227_v42 = vmul.bf16 1061961548, %v2399_v36 }
 0x222   :  { %v1235_v38 = vmul.bf16 %v1231_v34, %v2399_v36 }
 0x224   :  { %v1239_v39 = vadd.bf16 1065369472, %v1235_v38 }
 0x226   :  { %v1243_v19 = vmul.bf16 %v1239_v39, %v1227_v42  ;;  %v1247_v39 = vmul.bf16 1056980736, %v2399_v36 }
 0x227   :  { %v1663_v9 = vpop.f32.mrb[20].mxu0 }
 0x228   :  { %v1664_v14 = vpop.f32.mrb[21].mxu0  ;;  %1938 = vtanh.bf16 %v1243_v19 }
 0x229   :  { %v1703_v15 = vpop.f32.mrb[20].mxu1  ;;  %v1665_v16 = vadd.f32 %v1664_v14, %v1663_v9  ;;  %v1666_v35 = vpop.f32.mrb[22].mxu0 }
 0x22a   :  { %v1704_v18 = vpop.f32.mrb[21].mxu1  ;;  %v1667_v30 = vpop.f32.mrb[23].mxu0 }
 0x22b   :  { %v1136_v20 = vadd.f32 %v1665_v16, %v2395_v11  ;;  %v1705_v24 = vadd.f32 %v1704_v18, %v1703_v15  ;;  %v1706_v58 = vpop.f32.mrb[22].mxu1  ;;  %v1668_v54 = vadd.f32 %v1667_v30, %v1666_v35 }
 0x22c   :  { %v1707_v26 = vpop.f32.mrb[23].mxu1 }
 0x22d   :  { %v1201_v32 = vadd.f32 %v1705_v24, %v1136_v20  ;;  %v1139_v27 = vadd.f32 %v1668_v54, %v2395_v11  ;;  %v1708_v55 = vadd.f32 %v1707_v26, %v1706_v58 }
 0x22f   :  { %v1204_v13 = vadd.f32 %v1708_v55, %v1139_v27  ;;  %v1669_v45 = vpop.f32.mrb[24].mxu0 }
 0x230   :  { %v1670_v33 = vpop.f32.mrb[25].mxu0 }
 0x231   :  { %v1224_v37 = vpack.c.bf16 %v1204_v13, %v1201_v32  ;;  %v1709_v17 = vpop.f32.mrb[24].mxu1  ;;  %v1671_v57 = vadd.f32 %v1670_v33, %v1669_v45  ;;  %v1672_v49 = vpop.f32.mrb[26].mxu0 }
 0x232   :  { %v1710_v28 = vpop.f32.mrb[25].mxu1  ;;  %v1673_v40 = vpop.f32.mrb[27].mxu0 }
 0x233   :  { %v1232_v23 = vmul.bf16 1027030327, %v1224_v37  ;;  %v1144_v25 = vadd.f32 %v1671_v57, %v2395_v11  ;;  %v1711_v6 = vadd.f32 %v1710_v28, %v1709_v17  ;;  %v1712_v41 = vpop.f32.mrb[26].mxu1  ;;  %v1674_v8 = vadd.f32 %v1673_v40, %v1672_v49  ;;  %v1939_v60 = vpop.eup %1938 }
 0x234   :  { %v1713_v21 = vpop.f32.mrb[27].mxu1  ;;  %v1228_v5 = vmul.bf16 1061961548, %v1224_v37  ;;  %v1255_v4 = vadd.bf16 1065369472, %v1939_v60 }
 0x235   :  { %v1236_v10 = vmul.bf16 %v1232_v23, %v1224_v37  ;;  %v1209_v7 = vadd.f32 %v1711_v6, %v1144_v25  ;;  %v1147_v12 = vadd.f32 %v1674_v8, %v2395_v11  ;;  %v1714_v43 = vadd.f32 %v1713_v21, %v1712_v41 }
 0x236   :  { %v1259_v15 = vmul.bf16 %v1255_v4, %v1247_v39  ;;  %v1248_v24 = vmul.bf16 1056980736, %v1224_v37 }
 0x237   :  { %v1240_v0 = vadd.bf16 1065369472, %v1236_v10  ;;  %v1675_v44 = vpop.f32.mrb[28].mxu0  ;;  %v1212_v46 = vadd.f32 %v1714_v43, %v1147_v12 }
 0x238   :  { %v1676_v47 = vpop.f32.mrb[29].mxu0  ;;  %v2411_v30 = vunpack.c.l.bf16 %v1259_v15  ;;  %v2413_v19 = vunpack.c.h.bf16 %v1259_v15 }
 0x239   :  { %v1244_v48 = vmul.bf16 %v1240_v0, %v1228_v5  ;;  %v1715_v50 = vpop.f32.mrb[28].mxu1  ;;  %v1677_v59 = vadd.f32 %v1676_v47, %v1675_v44  ;;  %v1678_v22 = vpop.f32.mrb[30].mxu0  ;;  %v1225_v51 = vpack.c.bf16 %v1212_v46, %v1209_v7 }
 0x23a   :  { %v1716_v52 = vpop.f32.mrb[29].mxu1  ;;  %v1679_v53 = vpop.f32.mrb[31].mxu0  ;;  %v1286_v36 = vmul.f32 %v2411_v30, %v2411_v30  ;;  %v1287_v27 = vmul.f32 %v2413_v19, %v2413_v19  ;;  %v1271_v33 = vadd.f32 %v2413_v19, %v2411_v30 }
 0x23b   :  { %1940 = vtanh.bf16 %v1244_v48  ;;  %v1152_v29 = vadd.f32 %v1677_v59, %v2395_v11  ;;  %v1717_v56 = vadd.f32 %v1716_v52, %v1715_v50  ;;  %v1718_v61 = vpop.f32.mrb[30].mxu1  ;;  %v1680_v62 = vadd.f32 %v1679_v53, %v1678_v22 }
 0x23c   :  { %v1233_v63 = vmul.bf16 1027030327, %v1225_v51  ;;  %v1719_v3 = vpop.f32.mrb[31].mxu1  ;;  %v1229_v9 = vmul.bf16 1061961548, %v1225_v51  ;;  %v1294_v57 = vadd.f32 %v1287_v27, %v1286_v36 }
 0x23d   :  { %v1217_v1 = vadd.f32 %v1717_v56, %v1152_v29  ;;  %v1155_v2 = vadd.f32 %v1680_v62, %v2395_v11  ;;  %v1720_v38 = vadd.f32 %v1719_v3, %v1718_v61  ;;  %v1249_v25 = vmul.bf16 1056980736, %v1225_v51 }
 0x23e   :  { %v1237_v34 = vmul.bf16 %v1233_v63, %v1225_v51 }
 0x23f   :  { %v1220_v42 = vadd.f32 %v1720_v38, %v1155_v2 }
 0x240   :  { %v1241_v14 = vadd.bf16 1065369472, %v1237_v34 }
 0x241   :  { %v1226_v35 = vpack.c.bf16 %v1220_v42, %v1217_v1 }
 0x242   :  { %v1245_v16 = vmul.bf16 %v1241_v14, %v1229_v9 }
 0x243   :  { %v1234_v18 = vmul.bf16 1027030327, %v1226_v35  ;;  %v1230_v54 = vmul.bf16 1061961548, %v1226_v35  ;;  %v1250_v5 = vmul.bf16 1056980736, %v1226_v35 }
 0x244   :  { %1942 = vtanh.bf16 %v1245_v16 }
 0x245   :  { %v1238_v11 = vmul.bf16 %v1234_v18, %v1226_v35 }
 0x246   :  { %v1941_v20 = vpop.eup %1940 }
 0x247   :  { %v1256_v58 = vadd.bf16 1065369472, %v1941_v20  ;;  %v1242_v26 = vadd.bf16 1065369472, %v1238_v11  ;;  %v1310_v20 = vld [vmem:[%s2477_s7] sm:$0x1] }
 0x249   :  { %v1260_v32 = vmul.bf16 %v1256_v58, %v1248_v24  ;;  %v1246_v55 = vmul.bf16 %v1242_v26, %v1230_v54  ;;  %v1314_v58 = vld [vmem:[%s2478_s8] sm:$0x1] }
 0x24b   :  { %v2419_v13 = vunpack.c.l.bf16 %v1260_v32  ;;  %v2421_v45 = vunpack.c.h.bf16 %v1260_v32  ;;  %1944 = vtanh.bf16 %v1246_v55 }
 0x24d   :  { %v1288_v37 = vmul.f32 %v2419_v13, %v2419_v13  ;;  %v1272_v17 = vadd.f32 %v1271_v33, %v2419_v13  ;;  %v1289_v28 = vmul.f32 %v2421_v45, %v2421_v45 }
 0x24f   :  { %v1943_v49 = vpop.eup %1942  ;;  %v1273_v40 = vadd.f32 %v1272_v17, %v2421_v45  ;;  %v1295_v23 = vadd.f32 %v1294_v57, %v1288_v37 }
 0x250   :  { %v1257_v6 = vadd.bf16 1065369472, %v1943_v49 }
 0x251   :  { %v1296_v41 = vadd.f32 %v1295_v23, %v1289_v28 }
 0x252   :  { %v1261_v8 = vmul.bf16 %v1257_v6, %v1249_v25 }
 0x254   :  { %v1267_v10 = vunpack.c.l.bf16 %v1261_v8  ;;  %v1268_v21 = vunpack.c.h.bf16 %v1261_v8 }
 0x256   :  { %v1290_v7 = vmul.f32 %v1267_v10, %v1267_v10  ;;  %v1274_v12 = vadd.f32 %v1273_v40, %v1267_v10  ;;  %v1945_v43 = vpop.eup %1944  ;;  %v1291_v0 = vmul.f32 %v1268_v21, %v1268_v21 }
 0x257   :  { %v1258_v44 = vadd.bf16 1065369472, %v1945_v43 }
 0x258   :  { %v1275_v46 = vadd.f32 %v1274_v12, %v1268_v21  ;;  %v1297_v47 = vadd.f32 %v1296_v41, %v1290_v7 }
 0x259   :  { %v1262_v48 = vmul.bf16 %v1258_v44, %v1250_v5 }
 0x25a   :  { %v1298_v50 = vadd.f32 %v1297_v47, %v1291_v0 }
 0x25b   :  { %v1269_v59 = vunpack.c.l.bf16 %v1262_v48  ;;  %v1270_v22 = vunpack.c.h.bf16 %v1262_v48 }
 0x25d   :  { %v1292_v60 = vmul.f32 %v1269_v59, %v1269_v59  ;;  %v1276_v52 = vadd.f32 %v1275_v46, %v1269_v59  ;;  %v1293_v51 = vmul.f32 %v1270_v22, %v1270_v22 }
 0x25f   :  { %v1277_v53 = vadd.f32 %v1276_v52, %v1270_v22  ;;  %v1299_v29 = vadd.f32 %v1298_v50, %v1292_v60 }
 0x261   :  { %v1278_v56 = vrot.slane %v1277_v53, 4  ;;  %v1300_v61 = vadd.f32 %v1299_v29, %v1293_v51 }
 0x263   :  { %v1279_v62 = vadd.f32 %v1278_v56, %v1277_v53  ;;  %v1301_v63 = vrot.slane %v1300_v61, 4 }
 0x265   :  { %v1280_v1 = vrot.slane %v1279_v62, 2  ;;  %v1302_v2 = vadd.f32 %v1301_v63, %v1300_v61 }
 0x267   :  { %v1281_v3 = vadd.f32 %v1280_v1, %v1279_v62  ;;  %v1303_v4 = vrot.slane %v1302_v2, 2 }
 0x269   :  { %v1282_v34 = vrot.slane %v1281_v3, 1  ;;  %v1304_v38 = vadd.f32 %v1303_v4, %v1302_v2 }
 0x26b   :  { %v1283_v39 = vadd.f32 %v1282_v34, %v1281_v3  ;;  %v1305_v9 = vrot.slane %v1304_v38, 1 }
 0x26d   :  { %v1285_v14 = vmul.f32 0.015625, %v1283_v39  ;;  %v1306_v42 = vadd.f32 %v1305_v9, %v1304_v38 }
 0x26f   :  { %v1307_v15 = vmul.f32 0.015625, %v1306_v42  ;;  %v1308_v16 = vmul.f32 %v1285_v14, %v1285_v14 }
 0x271   :  { %v1309_v35 = vsub.f32 %v1307_v15, %v1308_v16 }
 0x273   :  { %v1311_v18 = vadd.f32 1e-05, %v1309_v35 }
 0x275   :  { %1946 = vrsqrt.f32 %v1311_v18 }
 0x27f   :  { %v1947_v11 = vpop.eup %1946 }
 0x280   :  { %v1313_v24 = vmul.f32 %v1947_v11, %v1310_v20 }
 0x282   :  { %v1315_v54 = vmul.f32 %v1313_v24, %v1285_v14  ;;  %v1321_v26 = vrot.slane %v1313_v24, %v2203_v31 }
 0x284   :  { %v1316_v32 = vsub.f32 %v1314_v58, %v1315_v54  ;;  %v1323_v36 = vmul.f32 %v1321_v26, %v2411_v30  ;;  %v1324_v27 = vmul.f32 %v1321_v26, %v2413_v19  ;;  %v1327_v55 = vmul.f32 %v1321_v26, %v1267_v10 }
 0x285   :  { %v1328_v33 = vmul.f32 %v1321_v26, %v1268_v21  ;;  %v1325_v37 = vmul.f32 %v1321_v26, %v2419_v13  ;;  %v1326_v17 = vmul.f32 %v1321_v26, %v2421_v45  ;;  %v1329_v57 = vmul.f32 %v1321_v26, %v1269_v59 }
 0x286   :  { %v1335_v49 = vrot.slane %v1316_v32, %v2203_v31  ;;  %v1330_v28 = vmul.f32 %v1321_v26, %v1270_v22  ;;  %v1624_v31 = vld [vmem:[%s2480_s10] ss:$0 sm:$0xff] }
 0x288   :  { %v1337_v40 = vadd.f32 %v1335_v49, %v1323_v36  ;;  %v1338_v23 = vadd.f32 %v1335_v49, %v1324_v27  ;;  %v1341_v25 = vadd.f32 %v1335_v49, %v1327_v55  ;;  %v1342_v6 = vadd.f32 %v1335_v49, %v1328_v33 }
 0x289   :  { %v1339_v41 = vadd.f32 %v1335_v49, %v1325_v37  ;;  %v1340_v8 = vadd.f32 %v1335_v49, %v1326_v17  ;;  %v1343_v7 = vadd.f32 %v1335_v49, %v1329_v57  ;;  %v1344_v30 = vadd.f32 %v1335_v49, %v1330_v28 }
 0x28a   :  { %v1345_v12 = vpack.c.bf16 %v1338_v23, %v1337_v40  ;;  %v1347_v19 = vpack.c.bf16 %v1342_v6, %v1341_v25 }
 0x28b   :  { %v1346_v10 = vpack.c.bf16 %v1340_v8, %v1339_v41  ;;  %v1348_v21 = vpack.c.bf16 %v1344_v30, %v1343_v7 }
 0x28c   :  { %1749 = vmatprep.mubr.bf16.mxu0 %v1345_v12  ;;  %1753 = vmatprep.mubr.bf16.mxu1 %v1347_v19 }
 0x28d   :  { %1750 = vmatmul.mubr.bf16.vlgmr.msra.gmra.mrb[32].mxu0 %v1346_v10  ;;  %1754 = vmatmul.mubr.bf16.vlgmr.msra.gmra.mrb[32].mxu1 %v1348_v21 }
 0x360   :  { %v1751_v13 = vpop.f32.mrb[32].mxu0  ;;  %v1755_v45 = vpop.f32.mrb[32].mxu1 }
 0x361   :  { %v1463_v43 = vadd.f32 %v1751_v13, %v1624_v31  ;;  %v1479_v5 = vadd.f32 %v1755_v45, %v1624_v31  ;;  %v1454_v0 = vpop.f32.mrb[33].mxu0  ;;  %v1470_v44 = vpop.f32.mrb[33].mxu1 }
 0x362   :  { %v1455_v46 = vadd.f32 %v1624_v31, %v1454_v0  ;;  %v1471_v47 = vadd.f32 %v1624_v31, %v1470_v44  ;;  %v1752_v48 = vpop.f32.mrb[34].mxu0  ;;  %v1756_v50 = vpop.f32.mrb[34].mxu1 }
 0x363   :  { %v1635_v59 = vmul.f32 -1.442695, %v1463_v43  ;;  %v1639_v22 = vmul.f32 -1.442695, %v1479_v5  ;;  %v1466_v60 = vadd.f32 %v1752_v48, %v1624_v31  ;;  %v1482_v52 = vadd.f32 %v1756_v50, %v1624_v31  ;;  %v1457_v51 = vpop.f32.mrb[35].mxu0  ;;  %v1473_v53 = vpop.f32.mrb[35].mxu1 }
 0x364   :  { %v1633_v29 = vmul.f32 -1.442695, %v1455_v46  ;;  %v1637_v56 = vmul.f32 -1.442695, %v1471_v47  ;;  %v1458_v61 = vadd.f32 %v1624_v31, %v1457_v51  ;;  %v1474_v62 = vadd.f32 %v1624_v31, %v1473_v53 }
 0x365   :  { %1948 = vpow2.f32 %v1635_v59  ;;  %v1636_v63 = vmul.f32 -1.442695, %v1466_v60  ;;  %v1640_v1 = vmul.f32 -1.442695, %v1482_v52 }
 0x366   :  { %1950 = vpow2.f32 %v1639_v22  ;;  %v1634_v2 = vmul.f32 -1.442695, %v1458_v61  ;;  %v1638_v3 = vmul.f32 -1.442695, %v1474_v62 }
 0x367   :  { %1952 = vpow2.f32 %v1633_v29 }
 0x368   :  { %1954 = vpow2.f32 %v1637_v56 }
 0x369   :  { %1956 = vpow2.f32 %v1636_v63 }
 0x36a   :  { %1958 = vpow2.f32 %v1640_v1 }
 0x36b   :  { %1960 = vpow2.f32 %v1634_v2 }
 0x36c   :  { %1962 = vpow2.f32 %v1638_v3 }
 0x36f   :  { %v1949_v4 = vpop.eup %1948 }
 0x370   :  { %v1951_v34 = vpop.eup %1950  ;;  %v1511_v38 = vadd.f32 1.0, %v1949_v4 }
 0x371   :  { %v1953_v39 = vpop.eup %1952  ;;  %v1515_v9 = vadd.f32 1.0, %v1951_v34 }
 0x372   :  { %v1955_v14 = vpop.eup %1954  ;;  %1964 = vrcp.f32 %v1511_v38  ;;  %v1509_v42 = vadd.f32 1.0, %v1953_v39 }
 0x373   :  { %v1957_v15 = vpop.eup %1956  ;;  %1966 = vrcp.f32 %v1515_v9  ;;  %v1513_v16 = vadd.f32 1.0, %v1955_v14 }
 0x374   :  { %v1959_v35 = vpop.eup %1958  ;;  %1968 = vrcp.f32 %v1509_v42  ;;  %v1512_v18 = vadd.f32 1.0, %v1957_v15 }
 0x375   :  { %v1961_v20 = vpop.eup %1960  ;;  %1970 = vrcp.f32 %v1513_v16  ;;  %v1516_v11 = vadd.f32 1.0, %v1959_v35 }
 0x376   :  { %v1963_v24 = vpop.eup %1962  ;;  %1972 = vrcp.f32 %v1512_v18  ;;  %v1510_v58 = vadd.f32 1.0, %v1961_v20 }
 0x377   :  { %1974 = vrcp.f32 %v1516_v11  ;;  %v1514_v54 = vadd.f32 1.0, %v1963_v24 }
 0x378   :  { %1976 = vrcp.f32 %v1510_v58 }
 0x379   :  { %1978 = vrcp.f32 %v1514_v54 }
 0x37c   :  { %v1965_v26 = vpop.eup %1964 }
 0x37d   :  { %v1967_v32 = vpop.eup %1966  ;;  %1535 = vst [vmem:[%s2481_s11 + $0x10] sm:$0xff] %v1965_v26 }
 0x37e   :  { %v1969_v36 = vpop.eup %1968  ;;  %1539 = vst [vmem:[%s2481_s11 + $0x30] sm:$0xff] %v1967_v32 }
 0x37f   :  { %v1971_v27 = vpop.eup %1970  ;;  %1533 = vst [vmem:[%s2481_s11] sm:$0xff] %v1969_v36 }
 0x380   :  { %v1973_v55 = vpop.eup %1972  ;;  %1537 = vst [vmem:[%s2481_s11 + $0x20] sm:$0xff] %v1971_v27 }
 0x381   :  { %v1975_v33 = vpop.eup %1974  ;;  %1536 = vst [vmem:[%s2481_s11 + $0x18] sm:$0xff] %v1973_v55 }
 0x382   :  { %v1977_v37 = vpop.eup %1976  ;;  %1540 = vst [vmem:[%s2481_s11 + $0x38] sm:$0xff] %v1975_v33 }
 0x383   :  { %v1979_v17 = vpop.eup %1978  ;;  %1534 = vst [vmem:[%s2481_s11 + $0x8] sm:$0xff] %v1977_v37 }
 0x384   :  { %1538 = vst [vmem:[%s2481_s11 + $0x28] sm:$0xff] %v1979_v17 }
 0x385   :  { %1545 = vsyncpa [#allocation3], 1 }
 0x386   :  { %1546 = vsyncpa [#allocation5], 1 }

</bundles_post_ra>
